<compile_context>
chip_gen: v6e
topology: v6e:2x2x1
jax: 0.10.0
libtpu: 0.0.40
codegen_flags: <defaults>
</compile_context>

<pallas_src>
import functools

import jax
import jax.numpy as jnp
from jax import lax
from jax.experimental import pallas as pl
from jax.experimental.pallas import tpu as pltpu

BN_EPS = 1e-5
OUT_PAD = 128  # lane-dense output width (true scalar output is column 0)


# ----------------------------------------------------------------------------
# Kernel
# ----------------------------------------------------------------------------
def _classification_kernel(
    seq_len,                     # python int: true S (for masking the tail chunk)
    ts,                          # python int: S-chunk size (multiple of 8)
    mask_last,                   # python bool: S % ts != 0
    z_ref,                       # [TB, TS, E]  (f32 or bf16)
    w1_ref, b1_ref,              # [E, H] bf16 (1/S folded in), [1, H] f32
    w2_ref, b2_ref,              # [H, H] bf16 (BN1 folded), [1, H] f32
    w3_ref, b3_ref,              # [H, OUT_PAD] bf16 (BN2 folded), [1, OUT_PAD] f32
    out_ref,                     # [TB, OUT_PAD] f32
    acc_ref,                     # [TB, 8, E] f32 scratch (sublane-preserving sum)
):
    s = pl.program_id(1)
    last = pl.num_programs(1) - 1
    tb, _, emb = acc_ref.shape
    n_slabs = ts // 8

    @pl.when(s == 0)
    def _():
        acc_ref[...] = jnp.zeros_like(acc_ref)

    def _chunk_sum(apply_mask):
        # Sum the [TB, TS, E] chunk over S in groups of 8 rows: pure VPU vreg
        # adds into a [TB, 8, E] partial sum (no per-step cross-sublane reduce
        # or relayout).  `apply_mask` zeroes rows >= seq_len on the tail chunk.
        def slab(g):
            v = z_ref[:, pl.ds(g * 8, 8), :].astype(jnp.float32)
            if apply_mask:
                row = s * ts + g * 8 + lax.broadcasted_iota(jnp.int32, (1, 8, 1), 1)
                v = jnp.where(row < seq_len, v, 0.0)
            return v

        total = slab(0)
        for g in range(1, n_slabs):
            total = total + slab(g)
        return total

    if mask_last:
        @pl.when(s == last)
        def _():
            acc_ref[...] += _chunk_sum(True)

        @pl.when(s != last)
        def _():
            acc_ref[...] += _chunk_sum(False)
    else:
        acc_ref[...] += _chunk_sum(False)

    @pl.when(s == last)
    def _():
        # Single sublane reduce per B tile: [TB, 8, E] -> [TB, E].  1/S is
        # folded into w1 on the host, so the raw sum feeds the first GEMM.
        pooled = jnp.sum(acc_ref[...], axis=1)

        # Linear(E -> H) + ReLU   (mean's 1/S already folded into w1)
        h = jnp.dot(pooled.astype(w1_ref.dtype), w1_ref[...],
                    preferred_element_type=jnp.float32) + b1_ref[...]
        h = jnp.maximum(h, 0.0)

        # Linear(H -> H) [BN1 folded] + ReLU
        h = jnp.dot(h.astype(w2_ref.dtype), w2_ref[...],
                    preferred_element_type=jnp.float32) + b2_ref[...]
        h = jnp.maximum(h, 0.0)

        # Linear(H -> 1) [BN2 folded], padded to OUT_PAD lanes (lane-dense store).
        y = jnp.dot(h.astype(w3_ref.dtype), w3_ref[...],
                    preferred_element_type=jnp.float32) + b3_ref[...]
        out_ref[...] = y.astype(out_ref.dtype)


# ----------------------------------------------------------------------------
# Host-side helpers
# ----------------------------------------------------------------------------
def _fold_bn_into_next_linear(gamma, beta, mean, var, w_next, b_next, eps=BN_EPS):
    """Eval-mode BN fold:  BN(h) = s*h + t ;  (s*h + t) @ W + b = h @ W' + b'."""
    s = gamma * lax.rsqrt(var + eps)          # [1, H]
    t = beta - mean * s                       # [1, H]
    w_folded = w_next * s.reshape(-1, 1)      # scale rows of W
    b_folded = b_next + t @ w_next            # [1, H_out]
    return w_folded, b_folded


def _round_up(x, m):
    return ((x + m - 1) // m) * m


def _vmem_budget_bytes():
    """Per-chip VMEM budget with headroom (compiler scratch / DMA descriptors)."""
    cap = 64 << 20                             # conservative default (v7x-sized)
    try:
        cap = int(pltpu.get_tpu_info().vmem_capacity_bytes)
    except Exception:
        pass
    return max(cap - (16 << 20), 24 << 20)     # v6e/v5e ~112 MiB, v7x ~48 MiB


def _choose_tiles(B, S, E, H, z_itemsize, budget):
    """Pick (tb, ts): resident weights + acc + 2 z buffers must fit `budget`."""
    # Resident (single-buffered) weights & biases.
    w_bytes = (E * H * 2 + H * H * 2 + H * OUT_PAD * 2            # bf16 weights
               + 2 * 8 * H * 4 + 8 * OUT_PAD * 4)                 # f32 biases (sublane-padded)
    # Prefer >= 2 B tiles so the "parallel" B axis can shard across the two
    # v7x TensorCores; cap tb at 256 (MXU-friendly GEMM M).
    tb = min(256, _round_up(B, 8))
    if B > 8:
        tb = min(tb, _round_up(pl.cdiv(B, 2), 8))
    ts_fit = 0
    while True:
        fixed = (w_bytes
                 + tb * 8 * E * 4              # acc scratch [tb, 8, E] f32
                 + 2 * tb * OUT_PAD * 4        # output block (double-buffered)
                 + (2 << 20))                  # margin
        avail = budget - fixed
        per_row = 2 * tb * E * z_itemsize      # double-buffered z rows
        ts_fit = (avail // per_row) if avail > 0 else 0
        if ts_fit >= 8 or tb <= 8:
            break
        tb = max(8, _round_up(tb // 2, 8))
    ts = max(8, min((int(ts_fit) // 8) * 8, _round_up(S, 8), 512))
    return tb, ts


def classification_layer(z, params):
    """z: [B, S, E] float32 or bfloat16 (no wrapper cast). Returns y: [B] f32."""
    B, S, E = z.shape
    (w1, b1, g1, be1, m1, v1,
     w2, b2, g2, be2, m2, v2,
     w3, b3) = params
    H = w1.shape[1]

    # --- fold BN layers into the following Linear layers (eval mode) --------
    w2f, b2f = _fold_bn_into_next_linear(g1, be1, m1, v1, w2, b2)
    w3f, b3f = _fold_bn_into_next_linear(g2, be2, m2, v2, w3, b3)

    # --- fold the pooling 1/S into the first Linear -------------------------
    w1f = w1 * (1.0 / float(S))

    # --- lane-dense final projection: pad H->1 to H->OUT_PAD ----------------
    w3p = jnp.pad(w3f, ((0, 0), (0, OUT_PAD - w3f.shape[1])))
    b3p = jnp.pad(b3f, ((0, 0), (0, OUT_PAD - b3f.shape[1])))

    # --- bf16 weight streaming (f32 accumulate on MXU); biases stay f32 -----
    w1c = w1f.astype(jnp.bfloat16)
    w2c = w2f.astype(jnp.bfloat16)
    w3c = w3p.astype(jnp.bfloat16)
    b1c = b1.astype(jnp.float32)
    b2c = b2f.astype(jnp.float32)
    b3c = b3p.astype(jnp.float32)

    # --- tiling: B parallel, S streamed reduction (partial tiles masked) ----
    budget = _vmem_budget_bytes()
    tb, ts = _choose_tiles(B, S, E, H, jnp.dtype(z.dtype).itemsize, budget)
    grid = (pl.cdiv(B, tb), pl.cdiv(S, ts))
    mask_last = (S % ts) != 0

    kernel = functools.partial(_classification_kernel, S, ts, mask_last)

    def _build(single_buffer_weights):
        wmode = {"pipeline_mode": pl.Buffered(1)} if single_buffer_weights else {}
        in_specs = [
            # z: streamed + pipelined.
            pl.BlockSpec((tb, ts, E), lambda b, s: (b, s, 0)),
            # Weights / biases: constant index maps -> DMA'd once, resident.
            pl.BlockSpec((E, H), lambda b, s: (0, 0), **wmode),
            pl.BlockSpec((1, H), lambda b, s: (0, 0), **wmode),
            pl.BlockSpec((H, H), lambda b, s: (0, 0), **wmode),
            pl.BlockSpec((1, H), lambda b, s: (0, 0), **wmode),
            pl.BlockSpec((H, OUT_PAD), lambda b, s: (0, 0), **wmode),
            pl.BlockSpec((1, OUT_PAD), lambda b, s: (0, 0), **wmode),
        ]
        return pl.pallas_call(
            kernel,
            out_shape=jax.ShapeDtypeStruct((B, OUT_PAD), jnp.float32),
            grid_spec=pltpu.PrefetchScalarGridSpec(
                num_scalar_prefetch=0,
                grid=grid,
                in_specs=in_specs,
                out_specs=pl.BlockSpec((tb, OUT_PAD), lambda b, s: (b, 0)),
                scratch_shapes=[pltpu.VMEM((tb, 8, E), jnp.float32)],
            ),
            compiler_params=pltpu.CompilerParams(
                dimension_semantics=("parallel", "arbitrary"),
                vmem_limit_bytes=int(budget),
            ),
        )

    args = (z, w1c, b1c, w2c, b2c, w3c, b3c)
    try:
        out = _build(True)(*args)
    except Exception:
        # Fallback if this jax version rejects single-buffered BlockSpecs.
        out = _build(False)(*args)

    return out[:, 0]                           # squeeze(-1): true output is column 0


def init_params(key, embed_dim, hidden_dim):
    """Deterministic PyTorch-style initialization (uniform +-1/sqrt(fan_in))."""
    ks = jax.random.split(key, 6)

    def lin(kw, kb, fan_in, fan_out):
        bound = 1.0 / (fan_in ** 0.5)
        w = jax.random.uniform(kw, (fan_in, fan_out), jnp.float32, -bound, bound)
        b = jax.random.uniform(kb, (1, fan_out), jnp.float32, -bound, bound)
        return w, b

    w1, b1 = lin(ks[0], ks[1], embed_dim, hidden_dim)
    w2, b2 = lin(ks[2], ks[3], hidden_dim, hidden_dim)
    w3, b3 = lin(ks[4], ks[5], hidden_dim, 1)

    # BatchNorm1d defaults: weight=1, bias=0, running_mean=0, running_var=1
    ones = jnp.ones((1, hidden_dim), jnp.float32)
    zeros = jnp.zeros((1, hidden_dim), jnp.float32)
    g1, be1, m1, v1 = ones, zeros, zeros, ones
    g2, be2, m2, v2 = ones, zeros, zeros, ones

    return (w1, b1, g1, be1, m1, v1,
            w2, b2, g2, be2, m2, v2,
            w3, b3)


def _reference(z, params):
    """Pure-JAX eval-mode reference matching the PyTorch module."""
    (w1, b1, g1, be1, m1, v1,
     w2, b2, g2, be2, m2, v2,
     w3, b3) = params
    pooled = jnp.mean(z.astype(jnp.float32), axis=1)
    h = jnp.maximum(pooled @ w1 + b1, 0.0)
    h = (h - m1) * lax.rsqrt(v1 + BN_EPS) * g1 + be1
    h = jnp.maximum(h @ w2 + b2, 0.0)
    h = (h - m2) * lax.rsqrt(v2 + BN_EPS) * g2 + be2
    return (h @ w3 + b3)[:, 0]


if __name__ == "__main__":
    # Small, deliberately non-tile-aligned shapes to exercise the in-kernel
    # S-tail mask and the partial B output tile (module default hidden_dim=2048
    # in production; 128 here for a fast test).
    B, S, E, H = 10, 12, 32, 128

    key = jax.random.PRNGKey(0)
    kz, kp = jax.random.split(key)
    z = jax.random.normal(kz, (B, S, E), jnp.float32)
    params = init_params(kp, E, H)

    y = classification_layer(z, params)
    jax.block_until_ready(y)
    assert y.shape == (B,)

    y_ref = _reference(z, params)
    assert jnp.allclose(y, y_ref, rtol=5e-2, atol=5e-2), (y, y_ref)

    print("KERNEL_OK")
</pallas_src>

<mosaic_0001>
module attributes {stable_mosaic.version = 11 : i64} {
  func.func @_classification_kernel(%arg0: i32, %arg1: i32, %arg2: memref<8x16x32xf32, #tpu.memory_space<vmem>>, %arg3: memref<32x128xbf16, #tpu.memory_space<vmem>>, %arg4: memref<1x128xf32, #tpu.memory_space<vmem>>, %arg5: memref<128x128xbf16, #tpu.memory_space<vmem>>, %arg6: memref<1x128xf32, #tpu.memory_space<vmem>>, %arg7: memref<128x128xbf16, #tpu.memory_space<vmem>>, %arg8: memref<1x128xf32, #tpu.memory_space<vmem>>, %arg9: memref<8x128xf32, #tpu.memory_space<vmem>>, %arg10: memref<8x8x32xf32, #tpu.memory_space<vmem>>) attributes {dimension_semantics = [#tpu.dimension_semantics<parallel>, #tpu.dimension_semantics<arbitrary>], iteration_bounds = array<i64: 2, 1>, scalar_prefetch = 0 : i64, scratch_operands = 1 : i64, tpu.core_type = #tpu.core_type<tc>, window_params = [{transform_indices = @transform_0, window_bounds = array<i64: 8, 16, 32>}, {pipeline_mode = #tpu.pipeline_mode<synchronous>, transform_indices = @transform_1, window_bounds = array<i64: 32, 128>}, {pipeline_mode = #tpu.pipeline_mode<synchronous>, transform_indices = @transform_2, window_bounds = array<i64: 1, 128>}, {pipeline_mode = #tpu.pipeline_mode<synchronous>, transform_indices = @transform_3, window_bounds = array<i64: 128, 128>}, {pipeline_mode = #tpu.pipeline_mode<synchronous>, transform_indices = @transform_4, window_bounds = array<i64: 1, 128>}, {pipeline_mode = #tpu.pipeline_mode<synchronous>, transform_indices = @transform_5, window_bounds = array<i64: 128, 128>}, {pipeline_mode = #tpu.pipeline_mode<synchronous>, transform_indices = @transform_6, window_bounds = array<i64: 1, 128>}, {transform_indices = @transform_7, window_bounds = array<i64: 8, 128>}]} {
    %c0_i32 = arith.constant 0 : i32
    %0 = arith.cmpi eq, %arg1, %c0_i32 : i32
    %1 = arith.extui %0 : i1 to i32
    %c0_i32_0 = arith.constant 0 : i32
    %2 = arith.cmpi ne, %1, %c0_i32_0 : i32
    scf.if %2 {
      %cst = arith.constant 0.000000e+00 : f32
      %12 = vector.broadcast %cst : f32 to vector<8x8x32xf32>
      %c0 = arith.constant 0 : index
      %c0_7 = arith.constant 0 : index
      %c0_8 = arith.constant 0 : index
      %13 = vector.load %arg10[%c0, %c0_7, %c0_8] : memref<8x8x32xf32, #tpu.memory_space<vmem>>, vector<8x8x32xf32>
      tpu.vector_store %arg10[%c0, %c0_7, %c0_8], %12 {strides = array<i32>} : memref<8x8x32xf32, #tpu.memory_space<vmem>>, vector<8x8x32xf32>,
    } else {
    }
    %c0_i32_1 = arith.constant 0 : i32
    %3 = arith.cmpi eq, %arg1, %c0_i32_1 : i32
    %4 = arith.extui %3 : i1 to i32
    %c0_i32_2 = arith.constant 0 : i32
    %5 = arith.cmpi ne, %4, %c0_i32_2 : i32
    scf.if %5 {
      %c0 = arith.constant 0 : index
      %c0_7 = arith.constant 0 : index
      %c0_8 = arith.constant 0 : index
      %12 = vector.load %arg10[%c0, %c0_7, %c0_8] : memref<8x8x32xf32, #tpu.memory_space<vmem>>, vector<8x8x32xf32>
      %c0_9 = arith.constant 0 : index
      %c0_10 = arith.constant 0 : index
      %c0_11 = arith.constant 0 : index
      %13 = vector.load %arg2[%c0_9, %c0_10, %c0_11] : memref<8x16x32xf32, #tpu.memory_space<vmem>>, vector<8x8x32xf32>
      %c16_i32 = arith.constant 16 : i32
      %14 = arith.muli %arg1, %c16_i32 : i32
      %c0_i32_12 = arith.constant 0 : i32
      %15 = arith.addi %14, %c0_i32_12 : i32
      %16 = tpu.iota {dimensions = array<i32: 1>} : vector<1x8x1xi32>
      %17 = vector.broadcast %15 : i32 to vector<1x8x1xi32>
      %18 = arith.addi %17, %16 : vector<1x8x1xi32>
      %c12_i32 = arith.constant 12 : i32
      %19 = vector.broadcast %c12_i32 : i32 to vector<1x8x1xi32>
      %20 = arith.cmpi slt, %18, %19 : vector<1x8x1xi32>
      %cst = arith.constant 0.000000e+00 : f32
      %21 = vector.shape_cast %20 : vector<1x8x1xi1> to vector<1x8x1xi1>
      %22 = vector.broadcast %21 : vector<1x8x1xi1> to vector<8x8x32xi1>
      %23 = vector.broadcast %cst : f32 to vector<8x8x32xf32>
      %24 = arith.select %22, %13, %23 : vector<8x8x32xi1>, vector<8x8x32xf32>
      %c0_13 = arith.constant 0 : index
      %c8 = arith.constant 8 : index
      %c0_14 = arith.constant 0 : index
      %25 = vector.load %arg2[%c0_13, %c8, %c0_14] : memref<8x16x32xf32, #tpu.memory_space<vmem>>, vector<8x8x32xf32>
      %c16_i32_15 = arith.constant 16 : i32
      %26 = arith.muli %arg1, %c16_i32_15 : i32
      %c8_i32 = arith.constant 8 : i32
      %27 = arith.addi %26, %c8_i32 : i32
      %28 = tpu.iota {dimensions = array<i32: 1>} : vector<1x8x1xi32>
      %29 = vector.broadcast %27 : i32 to vector<1x8x1xi32>
      %30 = arith.addi %29, %28 : vector<1x8x1xi32>
      %c12_i32_16 = arith.constant 12 : i32
      %31 = vector.broadcast %c12_i32_16 : i32 to vector<1x8x1xi32>
      %32 = arith.cmpi slt, %30, %31 : vector<1x8x1xi32>
      %cst_17 = arith.constant 0.000000e+00 : f32
      %33 = vector.shape_cast %32 : vector<1x8x1xi1> to vector<1x8x1xi1>
      %34 = vector.broadcast %33 : vector<1x8x1xi1> to vector<8x8x32xi1>
      %35 = vector.broadcast %cst_17 : f32 to vector<8x8x32xf32>
      %36 = arith.select %34, %25, %35 : vector<8x8x32xi1>, vector<8x8x32xf32>
      %37 = arith.addf %24, %36 : vector<8x8x32xf32>
      %38 = arith.addf %12, %37 : vector<8x8x32xf32>
      %c0_18 = arith.constant 0 : index
      %c0_19 = arith.constant 0 : index
      %c0_20 = arith.constant 0 : index
      %39 = vector.load %arg10[%c0_18, %c0_19, %c0_20] : memref<8x8x32xf32, #tpu.memory_space<vmem>>, vector<8x8x32xf32>
      tpu.vector_store %arg10[%c0_18, %c0_19, %c0_20], %38 {strides = array<i32>} : memref<8x8x32xf32, #tpu.memory_space<vmem>>, vector<8x8x32xf32>,
    } else {
    }
    %c0_i32_3 = arith.constant 0 : i32
    %6 = arith.cmpi ne, %arg1, %c0_i32_3 : i32
    %7 = arith.extui %6 : i1 to i32
    %c0_i32_4 = arith.constant 0 : i32
    %8 = arith.cmpi ne, %7, %c0_i32_4 : i32
    scf.if %8 {
      %c0 = arith.constant 0 : index
      %c0_7 = arith.constant 0 : index
      %c0_8 = arith.constant 0 : index
      %12 = vector.load %arg10[%c0, %c0_7, %c0_8] : memref<8x8x32xf32, #tpu.memory_space<vmem>>, vector<8x8x32xf32>
      %c0_9 = arith.constant 0 : index
      %c0_10 = arith.constant 0 : index
      %c0_11 = arith.constant 0 : index
      %13 = vector.load %arg2[%c0_9, %c0_10, %c0_11] : memref<8x16x32xf32, #tpu.memory_space<vmem>>, vector<8x8x32xf32>
      %c0_12 = arith.constant 0 : index
      %c8 = arith.constant 8 : index
      %c0_13 = arith.constant 0 : index
      %14 = vector.load %arg2[%c0_12, %c8, %c0_13] : memref<8x16x32xf32, #tpu.memory_space<vmem>>, vector<8x8x32xf32>
      %15 = arith.addf %13, %14 : vector<8x8x32xf32>
      %16 = arith.addf %12, %15 : vector<8x8x32xf32>
      %c0_14 = arith.constant 0 : index
      %c0_15 = arith.constant 0 : index
      %c0_16 = arith.constant 0 : index
      %17 = vector.load %arg10[%c0_14, %c0_15, %c0_16] : memref<8x8x32xf32, #tpu.memory_space<vmem>>, vector<8x8x32xf32>
      tpu.vector_store %arg10[%c0_14, %c0_15, %c0_16], %16 {strides = array<i32>} : memref<8x8x32xf32, #tpu.memory_space<vmem>>, vector<8x8x32xf32>,
    } else {
    }
    %c0_i32_5 = arith.constant 0 : i32
    %9 = arith.cmpi eq, %arg1, %c0_i32_5 : i32
    %10 = arith.extui %9 : i1 to i32
    %c0_i32_6 = arith.constant 0 : i32
    %11 = arith.cmpi ne, %10, %c0_i32_6 : i32
    scf.if %11 {
      %c0 = arith.constant 0 : index
      %c0_7 = arith.constant 0 : index
      %c0_8 = arith.constant 0 : index
      %12 = vector.load %arg10[%c0, %c0_7, %c0_8] : memref<8x8x32xf32, #tpu.memory_space<vmem>>, vector<8x8x32xf32>
      %cst = arith.constant dense<0.000000e+00> : vector<8x32xf32>
      %13 = vector.multi_reduction <add>, %12, %cst [1] : vector<8x8x32xf32> to vector<8x32xf32>
      %14 = arith.truncf %13 : vector<8x32xf32> to vector<8x32xbf16>
      %c0_9 = arith.constant 0 : index
      %c0_10 = arith.constant 0 : index
      %15 = vector.load %arg3[%c0_9, %c0_10] : memref<32x128xbf16, #tpu.memory_space<vmem>>, vector<32x128xbf16>
      %cst_11 = arith.constant dense<0.000000e+00> : vector<8x128xf32>
      %16 = tpu.matmul %14, %15, %cst_11 {dimension_numbers = #tpu.dot_dimension_numbers<[1], [0], [0], [1], [0, 0, 1, 1], [], []>} : vector<8x32xbf16>, vector<32x128xbf16>, vector<8x128xf32> -> vector<8x128xf32>
      %c0_12 = arith.constant 0 : index
      %c0_13 = arith.constant 0 : index
      %17 = vector.load %arg4[%c0_12, %c0_13] : memref<1x128xf32, #tpu.memory_space<vmem>>, vector<1x128xf32>
      %18 = vector.broadcast %17 : vector<1x128xf32> to vector<8x128xf32>
      %19 = arith.addf %16, %18 : vector<8x128xf32>
      %cst_14 = arith.constant 0.000000e+00 : f32
      %20 = vector.broadcast %cst_14 : f32 to vector<8x128xf32>
      %21 = arith.maximumf %19, %20 : vector<8x128xf32>
      %22 = arith.truncf %21 : vector<8x128xf32> to vector<8x128xbf16>
      %c0_15 = arith.constant 0 : index
      %c0_16 = arith.constant 0 : index
      %23 = vector.load %arg5[%c0_15, %c0_16] : memref<128x128xbf16, #tpu.memory_space<vmem>>, vector<128x128xbf16>
      %cst_17 = arith.constant dense<0.000000e+00> : vector<8x128xf32>
      %24 = tpu.matmul %22, %23, %cst_17 {dimension_numbers = #tpu.dot_dimension_numbers<[1], [0], [0], [1], [0, 0, 1, 1], [], []>} : vector<8x128xbf16>, vector<128x128xbf16>, vector<8x128xf32> -> vector<8x128xf32>
      %c0_18 = arith.constant 0 : index
      %c0_19 = arith.constant 0 : index
      %25 = vector.load %arg6[%c0_18, %c0_19] : memref<1x128xf32, #tpu.memory_space<vmem>>, vector<1x128xf32>
      %26 = vector.broadcast %25 : vector<1x128xf32> to vector<8x128xf32>
      %27 = arith.addf %24, %26 : vector<8x128xf32>
      %cst_20 = arith.constant 0.000000e+00 : f32
      %28 = vector.broadcast %cst_20 : f32 to vector<8x128xf32>
      %29 = arith.maximumf %27, %28 : vector<8x128xf32>
      %30 = arith.truncf %29 : vector<8x128xf32> to vector<8x128xbf16>
      %c0_21 = arith.constant 0 : index
      %c0_22 = arith.constant 0 : index
      %31 = vector.load %arg7[%c0_21, %c0_22] : memref<128x128xbf16, #tpu.memory_space<vmem>>, vector<128x128xbf16>
      %cst_23 = arith.constant dense<0.000000e+00> : vector<8x128xf32>
      %32 = tpu.matmul %30, %31, %cst_23 {dimension_numbers = #tpu.dot_dimension_numbers<[1], [0], [0], [1], [0, 0, 1, 1], [], []>} : vector<8x128xbf16>, vector<128x128xbf16>, vector<8x128xf32> -> vector<8x128xf32>
      %c0_24 = arith.constant 0 : index
      %c0_25 = arith.constant 0 : index
      %33 = vector.load %arg8[%c0_24, %c0_25] : memref<1x128xf32, #tpu.memory_space<vmem>>, vector<1x128xf32>
      %34 = vector.broadcast %33 : vector<1x128xf32> to vector<8x128xf32>
      %35 = arith.addf %32, %34 : vector<8x128xf32>
      %c0_26 = arith.constant 0 : index
      %c0_27 = arith.constant 0 : index
      %36 = vector.load %arg9[%c0_26, %c0_27] : memref<8x128xf32, #tpu.memory_space<vmem>>, vector<8x128xf32>
      tpu.vector_store %arg9[%c0_26, %c0_27], %35 {strides = array<i32>} : memref<8x128xf32, #tpu.memory_space<vmem>>, vector<8x128xf32>,
    } else {
    }
    return
  }
  func.func @transform_0(%arg0: i32, %arg1: i32) -> (i32, i32, i32) {
    %c0_i32 = arith.constant 0 : i32
    %c0_i32_0 = arith.constant 0 : i32
    return %arg0, %arg1, %c0_i32 : i32, i32, i32
  }
  func.func @transform_1(%arg0: i32, %arg1: i32) -> (i32, i32) {
    %c0_i32 = arith.constant 0 : i32
    %c0_i32_0 = arith.constant 0 : i32
    %c0_i32_1 = arith.constant 0 : i32
    return %c0_i32, %c0_i32_0 : i32, i32
  }
  func.func @transform_2(%arg0: i32, %arg1: i32) -> (i32, i32) {
    %c0_i32 = arith.constant 0 : i32
    %c0_i32_0 = arith.constant 0 : i32
    %c0_i32_1 = arith.constant 0 : i32
    return %c0_i32, %c0_i32_0 : i32, i32
  }
  func.func @transform_3(%arg0: i32, %arg1: i32) -> (i32, i32) {
    %c0_i32 = arith.constant 0 : i32
    %c0_i32_0 = arith.constant 0 : i32
    %c0_i32_1 = arith.constant 0 : i32
    return %c0_i32, %c0_i32_0 : i32, i32
  }
  func.func @transform_4(%arg0: i32, %arg1: i32) -> (i32, i32) {
    %c0_i32 = arith.constant 0 : i32
    %c0_i32_0 = arith.constant 0 : i32
    %c0_i32_1 = arith.constant 0 : i32
    return %c0_i32, %c0_i32_0 : i32, i32
  }
  func.func @transform_5(%arg0: i32, %arg1: i32) -> (i32, i32) {
    %c0_i32 = arith.constant 0 : i32
    %c0_i32_0 = arith.constant 0 : i32
    %c0_i32_1 = arith.constant 0 : i32
    return %c0_i32, %c0_i32_0 : i32, i32
  }
  func.func @transform_6(%arg0: i32, %arg1: i32) -> (i32, i32) {
    %c0_i32 = arith.constant 0 : i32
    %c0_i32_0 = arith.constant 0 : i32
    %c0_i32_1 = arith.constant 0 : i32
    return %c0_i32, %c0_i32_0 : i32, i32
  }
  func.func @transform_7(%arg0: i32, %arg1: i32) -> (i32, i32) {
    %c0_i32 = arith.constant 0 : i32
    %c0_i32_0 = arith.constant 0 : i32
    return %arg0, %c0_i32 : i32, i32
  }
}

module attributes {stable_mosaic.version = 11 : i64} {
  func.func @_classification_kernel(%arg0: i32, %arg1: i32, %arg2: memref<8x16x32xf32, #tpu.memory_space<vmem>>, %arg3: memref<32x128xbf16, #tpu.memory_space<vmem>>, %arg4: memref<1x128xf32, #tpu.memory_space<vmem>>, %arg5: memref<128x128xbf16, #tpu.memory_space<vmem>>, %arg6: memref<1x128xf32, #tpu.memory_space<vmem>>, %arg7: memref<128x128xbf16, #tpu.memory_space<vmem>>, %arg8: memref<1x128xf32, #tpu.memory_space<vmem>>, %arg9: memref<8x128xf32, #tpu.memory_space<vmem>>, %arg10: memref<8x8x32xf32, #tpu.memory_space<vmem>>) attributes {dimension_semantics = [#tpu.dimension_semantics<parallel>, #tpu.dimension_semantics<arbitrary>], iteration_bounds = array<i64: 2, 1>, scalar_prefetch = 0 : i64, scratch_operands = 1 : i64, tpu.core_type = #tpu.core_type<tc>, window_params = [{transform_indices = @transform_0, window_bounds = array<i64: 8, 16, 32>}, {pipeline_mode = #tpu.pipeline_mode<synchronous>, transform_indices = @transform_1, window_bounds = array<i64: 32, 128>}, {pipeline_mode = #tpu.pipeline_mode<synchronous>, transform_indices = @transform_2, window_bounds = array<i64: 1, 128>}, {pipeline_mode = #tpu.pipeline_mode<synchronous>, transform_indices = @transform_3, window_bounds = array<i64: 128, 128>}, {pipeline_mode = #tpu.pipeline_mode<synchronous>, transform_indices = @transform_4, window_bounds = array<i64: 1, 128>}, {pipeline_mode = #tpu.pipeline_mode<synchronous>, transform_indices = @transform_5, window_bounds = array<i64: 128, 128>}, {pipeline_mode = #tpu.pipeline_mode<synchronous>, transform_indices = @transform_6, window_bounds = array<i64: 1, 128>}, {transform_indices = @transform_7, window_bounds = array<i64: 8, 128>}]} {
    %c0_i32 = arith.constant 0 : i32
    %0 = arith.cmpi eq, %arg1, %c0_i32 : i32
    %1 = arith.extui %0 : i1 to i32
    %c0_i32_0 = arith.constant 0 : i32
    %2 = arith.cmpi ne, %1, %c0_i32_0 : i32
    scf.if %2 {
      %cst = arith.constant 0.000000e+00 : f32
      %12 = vector.broadcast %cst : f32 to vector<8x8x32xf32>
      %c0 = arith.constant 0 : index
      %c0_7 = arith.constant 0 : index
      %c0_8 = arith.constant 0 : index
      %13 = vector.load %arg10[%c0, %c0_7, %c0_8] : memref<8x8x32xf32, #tpu.memory_space<vmem>>, vector<8x8x32xf32>
      tpu.vector_store %arg10[%c0, %c0_7, %c0_8], %12 {strides = array<i32>} : memref<8x8x32xf32, #tpu.memory_space<vmem>>, vector<8x8x32xf32>,
    } else {
    }
    %c0_i32_1 = arith.constant 0 : i32
    %3 = arith.cmpi eq, %arg1, %c0_i32_1 : i32
    %4 = arith.extui %3 : i1 to i32
    %c0_i32_2 = arith.constant 0 : i32
    %5 = arith.cmpi ne, %4, %c0_i32_2 : i32
    scf.if %5 {
      %c0 = arith.constant 0 : index
      %c0_7 = arith.constant 0 : index
      %c0_8 = arith.constant 0 : index
      %12 = vector.load %arg10[%c0, %c0_7, %c0_8] : memref<8x8x32xf32, #tpu.memory_space<vmem>>, vector<8x8x32xf32>
      %c0_9 = arith.constant 0 : index
      %c0_10 = arith.constant 0 : index
      %c0_11 = arith.constant 0 : index
      %13 = vector.load %arg2[%c0_9, %c0_10, %c0_11] : memref<8x16x32xf32, #tpu.memory_space<vmem>>, vector<8x8x32xf32>
      %c16_i32 = arith.constant 16 : i32
      %14 = arith.muli %arg1, %c16_i32 : i32
      %c0_i32_12 = arith.constant 0 : i32
      %15 = arith.addi %14, %c0_i32_12 : i32
      %16 = tpu.iota {dimensions = array<i32: 1>} : vector<1x8x1xi32>
      %17 = vector.broadcast %15 : i32 to vector<1x8x1xi32>
      %18 = arith.addi %17, %16 : vector<1x8x1xi32>
      %c12_i32 = arith.constant 12 : i32
      %19 = vector.broadcast %c12_i32 : i32 to vector<1x8x1xi32>
      %20 = arith.cmpi slt, %18, %19 : vector<1x8x1xi32>
      %cst = arith.constant 0.000000e+00 : f32
      %21 = vector.shape_cast %20 : vector<1x8x1xi1> to vector<1x8x1xi1>
      %22 = vector.broadcast %21 : vector<1x8x1xi1> to vector<8x8x32xi1>
      %23 = vector.broadcast %cst : f32 to vector<8x8x32xf32>
      %24 = arith.select %22, %13, %23 : vector<8x8x32xi1>, vector<8x8x32xf32>
      %c0_13 = arith.constant 0 : index
      %c8 = arith.constant 8 : index
      %c0_14 = arith.constant 0 : index
      %25 = vector.load %arg2[%c0_13, %c8, %c0_14] : memref<8x16x32xf32, #tpu.memory_space<vmem>>, vector<8x8x32xf32>
      %c16_i32_15 = arith.constant 16 : i32
      %26 = arith.muli %arg1, %c16_i32_15 : i32
      %c8_i32 = arith.constant 8 : i32
      %27 = arith.addi %26, %c8_i32 : i32
      %28 = tpu.iota {dimensions = array<i32: 1>} : vector<1x8x1xi32>
      %29 = vector.broadcast %27 : i32 to vector<1x8x1xi32>
      %30 = arith.addi %29, %28 : vector<1x8x1xi32>
      %c12_i32_16 = arith.constant 12 : i32
      %31 = vector.broadcast %c12_i32_16 : i32 to vector<1x8x1xi32>
      %32 = arith.cmpi slt, %30, %31 : vector<1x8x1xi32>
      %cst_17 = arith.constant 0.000000e+00 : f32
      %33 = vector.shape_cast %32 : vector<1x8x1xi1> to vector<1x8x1xi1>
      %34 = vector.broadcast %33 : vector<1x8x1xi1> to vector<8x8x32xi1>
      %35 = vector.broadcast %cst_17 : f32 to vector<8x8x32xf32>
      %36 = arith.select %34, %25, %35 : vector<8x8x32xi1>, vector<8x8x32xf32>
      %37 = arith.addf %24, %36 : vector<8x8x32xf32>
      %38 = arith.addf %12, %37 : vector<8x8x32xf32>
      %c0_18 = arith.constant 0 : index
      %c0_19 = arith.constant 0 : index
      %c0_20 = arith.constant 0 : index
      %39 = vector.load %arg10[%c0_18, %c0_19, %c0_20] : memref<8x8x32xf32, #tpu.memory_space<vmem>>, vector<8x8x32xf32>
      tpu.vector_store %arg10[%c0_18, %c0_19, %c0_20], %38 {strides = array<i32>} : memref<8x8x32xf32, #tpu.memory_space<vmem>>, vector<8x8x32xf32>,
    } else {
    }
    %c0_i32_3 = arith.constant 0 : i32
    %6 = arith.cmpi ne, %arg1, %c0_i32_3 : i32
    %7 = arith.extui %6 : i1 to i32
    %c0_i32_4 = arith.constant 0 : i32
    %8 = arith.cmpi ne, %7, %c0_i32_4 : i32
    scf.if %8 {
      %c0 = arith.constant 0 : index
      %c0_7 = arith.constant 0 : index
      %c0_8 = arith.constant 0 : index
      %12 = vector.load %arg10[%c0, %c0_7, %c0_8] : memref<8x8x32xf32, #tpu.memory_space<vmem>>, vector<8x8x32xf32>
      %c0_9 = arith.constant 0 : index
      %c0_10 = arith.constant 0 : index
      %c0_11 = arith.constant 0 : index
      %13 = vector.load %arg2[%c0_9, %c0_10, %c0_11] : memref<8x16x32xf32, #tpu.memory_space<vmem>>, vector<8x8x32xf32>
      %c0_12 = arith.constant 0 : index
      %c8 = arith.constant 8 : index
      %c0_13 = arith.constant 0 : index
      %14 = vector.load %arg2[%c0_12, %c8, %c0_13] : memref<8x16x32xf32, #tpu.memory_space<vmem>>, vector<8x8x32xf32>
      %15 = arith.addf %13, %14 : vector<8x8x32xf32>
      %16 = arith.addf %12, %15 : vector<8x8x32xf32>
      %c0_14 = arith.constant 0 : index
      %c0_15 = arith.constant 0 : index
      %c0_16 = arith.constant 0 : index
      %17 = vector.load %arg10[%c0_14, %c0_15, %c0_16] : memref<8x8x32xf32, #tpu.memory_space<vmem>>, vector<8x8x32xf32>
      tpu.vector_store %arg10[%c0_14, %c0_15, %c0_16], %16 {strides = array<i32>} : memref<8x8x32xf32, #tpu.memory_space<vmem>>, vector<8x8x32xf32>,
    } else {
    }
    %c0_i32_5 = arith.constant 0 : i32
    %9 = arith.cmpi eq, %arg1, %c0_i32_5 : i32
    %10 = arith.extui %9 : i1 to i32
    %c0_i32_6 = arith.constant 0 : i32
    %11 = arith.cmpi ne, %10, %c0_i32_6 : i32
    scf.if %11 {
      %c0 = arith.constant 0 : index
      %c0_7 = arith.constant 0 : index
      %c0_8 = arith.constant 0 : index
      %12 = vector.load %arg10[%c0, %c0_7, %c0_8] : memref<8x8x32xf32, #tpu.memory_space<vmem>>, vector<8x8x32xf32>
      %cst = arith.constant dense<0.000000e+00> : vector<8x32xf32>
      %13 = vector.multi_reduction <add>, %12, %cst [1] : vector<8x8x32xf32> to vector<8x32xf32>
      %14 = arith.truncf %13 : vector<8x32xf32> to vector<8x32xbf16>
      %c0_9 = arith.constant 0 : index
      %c0_10 = arith.constant 0 : index
      %15 = vector.load %arg3[%c0_9, %c0_10] : memref<32x128xbf16, #tpu.memory_space<vmem>>, vector<32x128xbf16>
      %cst_11 = arith.constant dense<0.000000e+00> : vector<8x128xf32>
      %16 = tpu.matmul %14, %15, %cst_11 {dimension_numbers = #tpu.dot_dimension_numbers<[1], [0], [0], [1], [0, 0, 1, 1], [], []>} : vector<8x32xbf16>, vector<32x128xbf16>, vector<8x128xf32> -> vector<8x128xf32>
      %c0_12 = arith.constant 0 : index
      %c0_13 = arith.constant 0 : index
      %17 = vector.load %arg4[%c0_12, %c0_13] : memref<1x128xf32, #tpu.memory_space<vmem>>, vector<1x128xf32>
      %18 = vector.broadcast %17 : vector<1x128xf32> to vector<8x128xf32>
      %19 = arith.addf %16, %18 : vector<8x128xf32>
      %cst_14 = arith.constant 0.000000e+00 : f32
      %20 = vector.broadcast %cst_14 : f32 to vector<8x128xf32>
      %21 = arith.maximumf %19, %20 : vector<8x128xf32>
      %22 = arith.truncf %21 : vector<8x128xf32> to vector<8x128xbf16>
      %c0_15 = arith.constant 0 : index
      %c0_16 = arith.constant 0 : index
      %23 = vector.load %arg5[%c0_15, %c0_16] : memref<128x128xbf16, #tpu.memory_space<vmem>>, vector<128x128xbf16>
      %cst_17 = arith.constant dense<0.000000e+00> : vector<8x128xf32>
      %24 = tpu.matmul %22, %23, %cst_17 {dimension_numbers = #tpu.dot_dimension_numbers<[1], [0], [0], [1], [0, 0, 1, 1], [], []>} : vector<8x128xbf16>, vector<128x128xbf16>, vector<8x128xf32> -> vector<8x128xf32>
      %c0_18 = arith.constant 0 : index
      %c0_19 = arith.constant 0 : index
      %25 = vector.load %arg6[%c0_18, %c0_19] : memref<1x128xf32, #tpu.memory_space<vmem>>, vector<1x128xf32>
      %26 = vector.broadcast %25 : vector<1x128xf32> to vector<8x128xf32>
      %27 = arith.addf %24, %26 : vector<8x128xf32>
      %cst_20 = arith.constant 0.000000e+00 : f32
      %28 = vector.broadcast %cst_20 : f32 to vector<8x128xf32>
      %29 = arith.maximumf %27, %28 : vector<8x128xf32>
      %30 = arith.truncf %29 : vector<8x128xf32> to vector<8x128xbf16>
      %c0_21 = arith.constant 0 : index
      %c0_22 = arith.constant 0 : index
      %31 = vector.load %arg7[%c0_21, %c0_22] : memref<128x128xbf16, #tpu.memory_space<vmem>>, vector<128x128xbf16>
      %cst_23 = arith.constant dense<0.000000e+00> : vector<8x128xf32>
      %32 = tpu.matmul %30, %31, %cst_23 {dimension_numbers = #tpu.dot_dimension_numbers<[1], [0], [0], [1], [0, 0, 1, 1], [], []>} : vector<8x128xbf16>, vector<128x128xbf16>, vector<8x128xf32> -> vector<8x128xf32>
      %c0_24 = arith.constant 0 : index
      %c0_25 = arith.constant 0 : index
      %33 = vector.load %arg8[%c0_24, %c0_25] : memref<1x128xf32, #tpu.memory_space<vmem>>, vector<1x128xf32>
      %34 = vector.broadcast %33 : vector<1x128xf32> to vector<8x128xf32>
      %35 = arith.addf %32, %34 : vector<8x128xf32>
      %c0_26 = arith.constant 0 : index
      %c0_27 = arith.constant 0 : index
      %36 = vector.load %arg9[%c0_26, %c0_27] : memref<8x128xf32, #tpu.memory_space<vmem>>, vector<8x128xf32>
      tpu.vector_store %arg9[%c0_26, %c0_27], %35 {strides = array<i32>} : memref<8x128xf32, #tpu.memory_space<vmem>>, vector<8x128xf32>,
    } else {
    }
    return
  }
  func.func @transform_0(%arg0: i32, %arg1: i32) -> (i32, i32, i32) {
    %c0_i32 = arith.constant 0 : i32
    %c0_i32_0 = arith.constant 0 : i32
    return %arg0, %arg1, %c0_i32 : i32, i32, i32
  }
  func.func @transform_1(%arg0: i32, %arg1: i32) -> (i32, i32) {
    %c0_i32 = arith.constant 0 : i32
    %c0_i32_0 = arith.constant 0 : i32
    %c0_i32_1 = arith.constant 0 : i32
    return %c0_i32, %c0_i32_0 : i32, i32
  }
  func.func @transform_2(%arg0: i32, %arg1: i32) -> (i32, i32) {
    %c0_i32 = arith.constant 0 : i32
    %c0_i32_0 = arith.constant 0 : i32
    %c0_i32_1 = arith.constant 0 : i32
    return %c0_i32, %c0_i32_0 : i32, i32
  }
  func.func @transform_3(%arg0: i32, %arg1: i32) -> (i32, i32) {
    %c0_i32 = arith.constant 0 : i32
    %c0_i32_0 = arith.constant 0 : i32
    %c0_i32_1 = arith.constant 0 : i32
    return %c0_i32, %c0_i32_0 : i32, i32
  }
  func.func @transform_4(%arg0: i32, %arg1: i32) -> (i32, i32) {
    %c0_i32 = arith.constant 0 : i32
    %c0_i32_0 = arith.constant 0 : i32
    %c0_i32_1 = arith.constant 0 : i32
    return %c0_i32, %c0_i32_0 : i32, i32
  }
  func.func @transform_5(%arg0: i32, %arg1: i32) -> (i32, i32) {
    %c0_i32 = arith.constant 0 : i32
    %c0_i32_0 = arith.constant 0 : i32
    %c0_i32_1 = arith.constant 0 : i32
    return %c0_i32, %c0_i32_0 : i32, i32
  }
  func.func @transform_6(%arg0: i32, %arg1: i32) -> (i32, i32) {
    %c0_i32 = arith.constant 0 : i32
    %c0_i32_0 = arith.constant 0 : i32
    %c0_i32_1 = arith.constant 0 : i32
    return %c0_i32, %c0_i32_0 : i32, i32
  }
  func.func @transform_7(%arg0: i32, %arg1: i32) -> (i32, i32) {
    %c0_i32 = arith.constant 0 : i32
    %c0_i32_0 = arith.constant 0 : i32
    return %arg0, %c0_i32 : i32, i32
  }
}

</mosaic_0001>

<bundles_post_ra>
// kernel: tpu_custom_call.1
= control target key start
LH: loop header
LB: loop body
LE: loop exit
PB: predicated region body
PF: predicated region fallthrough
CT: control target
= control target key end

     0   :  { %12 = vsyncpa [#allocation4], 0  ;;  %s1853_s0 = inlined_call_operand.hbm [shape: f32[10,12,32], index: 0, kind: input, shape index: {}]   ;;  %s1854_s1 = inlined_call_operand.hbm [shape: bf16[32,128], index: 1, kind: input, shape index: {}]   ;;  %s1855_s2 = inlined_call_operand.vmem [shape: f32[1,128], index: 2, kind: input, shape index: {}]   ;;  %s1856_s3 = inlined_call_operand.hbm [shape: bf16[128,128], index: 3, kind: input, shape index: {}]   ;;  %s1857_s4 = inlined_call_operand.vmem [shape: f32[1,128], index: 4, kind: input, shape index: {}]   ;;  %s1858_s5 = inlined_call_operand.hbm [shape: bf16[128,128], index: 5, kind: input, shape index: {}]   ;;  %s1859_s6 = inlined_call_operand.vmem [shape: f32[1,128], index: 6, kind: input, shape index: {}]   ;;  %s1860_s7 = inlined_call_operand.hbm [shape: f32[10,128], index: 7, kind: output, shape index: {}]  }
   0x1   :  { %14 = vsyncpa [#allocation4 + $0x1], 0 }
   0x2   :  { %15 = vsyncpa [#allocation7], 0 }
   0x3   :  { %16 = vsyncpa [#allocation10], 0 }
   0x4   :  { %17 = vsyncpa [#allocation5], 0 }
   0x5   :  { %19 = vsyncpa [#allocation5 + $0x1], 0  ;;  %s1521_s24 = smov 0   ;;  %s1523_s25 = smov 0  }
   0x6   :  { %s1525_s26 = smov 0   ;;  %s1527_s27 = smov 0  }
   0x7   :  { %s1529_s28 = smov 0   ;;  %s1531_s29 = smov 0  }
   0x8 LB: > { %s1042_s30 = sadd.s32 4294967295, %s1468_s29   ;;  %s1043_s8 = sadd.s32 4294967294, %s1468_s29   ;;  %s1468_s29 = sphi %s1531_s29, %s25_s29   ;;  %s1464_s28 = sphi %s1529_s28, %s1882_s28   ;;  %s1460_s27 = sphi %s1527_s27, %s1881_s27   ;;  %s1456_s26 = sphi %s1525_s26, %s1880_s26   ;;  %s1452_s25 = sphi %s1523_s25, %s1879_s25   ;;  %s1448_s24 = sphi %s1521_s24, %s1878_s24  }
   0x9   : > { %s37_s9 = sadd.s32 1, %s1464_s28  ;;  %s46_s10 = sadd.s32 1, %s1456_s26 }
   0xa   : > { %p39_p0 = scmp.ge.s32.totalorder %s37_s9, 2  ;;  %p53_p1 = scmp.ne.s32.totalorder %s1456_s26, %s1452_s25 }
   0xb   : > { %p54_p2 = scmp.eq.s32.totalorder %s1468_s29, 0  ;;  %p59_p3 = scmp.ne.s32.totalorder %s1452_s25, %s1448_s24 }
   0xc   : > { %s1884_s9 = smov (%p39_p0, %s37_s9), 0  ;;  %p1566_p5 = scmp.eq.s32.totalorder %s1042_s30, 0 }
   0xd   : > { %1864 = sst [smem:[#allocation16_spill]] %s1884_s9  ;;  %p1562_p4 = por %p54_p2, %p53_p1 }
   0xe   : > { %s41_s13 = ssub.s32 %s1464_s28, %s1884_s9  ;;  %p209_p6 = scmp.eq.s32.totalorder %s1042_s30, 1 }
   0xf   : > { %p44_p7 = scmp.eq.s32.totalorder %s41_s13, 0  ;;  %p1574_p8 = por %p1566_p5, %p59_p3 }
  0x10   : > { %p1578_p9 = por %p209_p6, %p53_p1  ;;  %p215_p10 = scmp.eq.s32.totalorder %s1043_s8, 1 }
  0x11   : > { %s1583_s16 = scalar_select %p44_p7, %s1456_s26, %s46_s10  }
  0x12   : > { %s1868_s15 = scalar_select %p1578_p9, 1, 0 }
  0x13   : > { %1869 = sst [smem:[#allocation17_spill]] %s1583_s16  ;;  %p1585_p11 = por %p215_p10, %p59_p3 }
  0x14   : > { %p1044_p12 = scmp.ge.s32.totalorder %s1468_s29, 1  ;;  %p222_p13 = scmp.lt.s32.totalorder %s1468_s29, 3 }
  0x15   : > { %s1870_s17 = scalar_select %p1585_p11, 1, 0 }
  0x16   : > { %p1591_p0 = pnand %p1044_p12, %p222_p13  ;;  %s1470_s19 = smov [#allocation6]  }
  0x17   : > { %s234_s20 = sshll.u32 %s1470_s19, 4  ;;  %s1471_s21 = smov [#allocation8]   ;;  %s235_s20 = int_to_ptr.vmem [resolvable:$true] %s234_s20 }
  0x18   : > { %p1180_p1 = pneg %p1591_p0  ;;  %s250_s22 = sshll.u32 %s1471_s21, 4  ;;  %s1603_s22 = int_to_ptr.vmem [resolvable:$true] %s250_s22 }
  0x19   : > { %s1472_s30 = smov [#allocation9]   ;;  %s1287_s10 = scalar_lea.vmem %s235_s20, 256 }
  0x1a   : > { %p1599_p2 = pnand %p1180_p1, %p1566_p5  ;;  %s266_s8 = sshll.u32 %s1472_s30, 4  ;;  %s1605_s8 = int_to_ptr.vmem [resolvable:$true] %s266_s8 }
  0x1b   : > { %p1288_p6 = scmp.ne.s32.totalorder %s235_s20, %s1287_s10  ;;  %p1295_p12 = scmp.lt.s32.totalorder %s235_s20, %s235_s20 }
  0x1c   : > { %p1278_p3 = pneg %p1599_p2  ;;  %p1296_p13 = scmp.lt.s32.totalorder %s1287_s10, %s1287_s10 }
  0x1e   : > { %p1290_p7 = pnand %p1288_p6, %p1278_p3  ;;  %p1297_p1 = por %p1296_p13, %p1295_p12 }
  0x20   : > { %p1291_p10 = pneg %p1290_p7 }
  0x22   : > { %p1298_p11 = pnand %p1297_p1, %p1291_p10 }
  0x24   : > { %1301 = shalt.err (!%p1298_p11)
}
  0x25   : > { %s1473_s13 = smov 64   ;;  %s1474_s19 = smov 4  }
  0x26   : > { %1183 = dma.hbm_to_vmem [thread:$0]  (!%p1599_p2), %s1854_s1, 256, %s235_s20, [#allocation7], %s1473_s13, %s1473_s13, %s1474_s19  }
  0x27   : > { %s1313_s9 = scalar_lea.vmem %s1603_s22, 1024  ;;  %p1321_p11 = scmp.lt.s32.totalorder %s1603_s22, %s1603_s22 }
  0x28   : > { %p1314_p6 = scmp.ne.s32.totalorder %s1603_s22, %s1313_s9  ;;  %p1322_p10 = scmp.lt.s32.totalorder %s1313_s9, %s1313_s9 }
  0x2a   : > { %p1316_p7 = pnand %p1314_p6, %p1278_p3  ;;  %p1323_p13 = por %p1322_p10, %p1321_p11 }
  0x2c   : > { %p1317_p12 = pneg %p1316_p7 }
  0x2e   : > { %p1324_p1 = pnand %p1323_p13, %p1317_p12 }
  0x30   : > { %1327 = shalt.err (!%p1324_p1)
}
  0x31   : > { %1186 = dma.hbm_to_vmem [thread:$0]  (!%p1599_p2), %s1856_s3, 1024, %s1603_s22, [#allocation7], %s1473_s13, %s1473_s13, %s1474_s19  }
  0x32   : > { %s1339_s20 = scalar_lea.vmem %s1605_s8, 1024  ;;  %p1347_p12 = scmp.lt.s32.totalorder %s1605_s8, %s1605_s8 }
  0x33   : > { %p1340_p6 = scmp.ne.s32.totalorder %s1605_s8, %s1339_s20  ;;  %p1348_p11 = scmp.lt.s32.totalorder %s1339_s20, %s1339_s20 }
  0x35   : > { %p1342_p7 = pnand %p1340_p6, %p1278_p3  ;;  %p1349_p10 = por %p1348_p11, %p1347_p12 }
  0x37   : > { %p1343_p9 = pneg %p1342_p7 }
  0x39   : > { %p1350_p13 = pnand %p1349_p10, %p1343_p9 }
  0x3b   : > { %1353 = shalt.err (!%p1350_p13)
}
  0x3c   : > { %1189 = dma.hbm_to_vmem [thread:$0]  (!%p1599_p2), %s1858_s5, 1024, %s1605_s8, [#allocation10], %s1473_s13, %s1473_s13, %s1474_s19  }
  0x3d   : > { %p1863_p1 = scmp.ge.s32.totalorder %s1468_s29, 2 }
  0x3f   : > { %279 = sbr.rel (%p1863_p1) target bundleno = 100 (0x64), region = 40 }
  0x44   : > { %282 = sbr.rel (!%p1562_p4) target bundleno = 100 (0x64), region = 44  ;;  %s283_s22 = sand.u32 (%p1562_p4), 1, %s1456_s26  }
  0x45   : > { %s1050_s21 = sshll.u32 (%p1562_p4), %s1464_s28, 3  ;;  %s1049_s30 = sshll.u32 (%p1562_p4), %s283_s22, 7 }
  0x46   : > { %s290_s10 = ssub.s32 (%p1562_p4), 10, %s1050_s21  ;;  %s1653_s13 = scalar_lea.sflag (%p1562_p4), [#allocation4], %s283_s22 }
  0x47   : > { %p291_p9 = scmp.lt.s32.totalorder (%p1562_p4), %s290_s10, 8  ;;  %s287_s19 = scalar_lea.vmem (%p1562_p4), [#allocation3], %s1049_s30 }
  0x49   : > { %s1886_s10 = smov (!%p291_p9, %s290_s10), 8 }
  0x4a   : > { %s1650_s23 = sshll.u32 %s1886_s10, 8 }
  0x4b   : > { %s296_s8 = ssub.s32 2048, %s1650_s23 }
  0x4c   : > { %297 = vsyncadd %s1653_s13, %s296_s8  ;;  %p1053_p4 = scmp.ne.s32.totalorder %s1650_s23, 0  ;;  %s1093_s11 = sshll.u32 %s1464_s28, 11 }
  0x4d   : > { %s1661_s16 = scalar_lea.hbm %s1853_s0, %s1093_s11  ;;  %s305_s21 = sshll.u32 %s287_s19, 4  ;;  %s1663_s21 = int_to_ptr.vmem [resolvable:$true] %s305_s21 }
  0x4e   : > { %s1354_s22 = scalar_lea.hbm %s1661_s16, %s1650_s23  ;;  %s1358_s8 = scalar_lea.hbm %s1853_s0, 2560 }
  0x4f   : > { %p1355_p2 = scmp.ne.s32.totalorder %s1661_s16, %s1354_s22  ;;  %p1360_p7 = scmp.lt.s32.totalorder %s1358_s8, %s1354_s22 }
  0x51   : > { %p1356_p3 = pnand %p1355_p2, %p1053_p4 }
  0x53   : > { %p1357_p6 = pneg %p1356_p3 }
  0x55   : > { %p1362_p12 = pnand %p1360_p7, %p1357_p6 }
  0x57   : > { %1365 = shalt.err (!%p1362_p12)
}
  0x58   : > { %s1366_s19 = scalar_lea.vmem %s1663_s21, %s1650_s23  ;;  %s1475_s11 = smov [#allocation3]  }
  0x59   : > { %p1367_p11 = scmp.ne.s32.totalorder %s1663_s21, %s1366_s19  ;;  %s1370_s20 = sshll.u32 %s1475_s11, 4  ;;  %s1371_s20 = int_to_ptr.vmem [resolvable:$false] %s1370_s20 }
  0x5a   : > { %s1372_s9 = scalar_lea.vmem %s1371_s20, 4096  ;;  %p1373_p9 = scmp.lt.s32.totalorder %s1663_s21, %s1371_s20 }
  0x5b   : > { %p1368_p10 = pnand %p1367_p11, %p1053_p4  ;;  %p1374_p2 = scmp.lt.s32.totalorder %s1372_s9, %s1366_s19 }
  0x5d   : > { %p1369_p13 = pneg %p1368_p10  ;;  %p1375_p3 = por %p1374_p2, %p1373_p9 }
  0x5f   : > { %p1376_p1 = pnand %p1375_p3, %p1369_p13 }
  0x61   : > { %1379 = shalt.err (!%p1376_p1)
}
  0x62   : > { %s1476_s22 = smov 128   ;;  %s1477_s30 = smov 8  }
  0x63   : > { %311 = dma.hbm_to_vmem [thread:$0]  (%p1053_p4), %s1661_s16, %s1650_s23, %s1663_s21, %s1653_s13, %s1476_s22, %s1476_s22, %s1477_s30  }
  0x64 PF: > { %317 = sbr.rel (%p1591_p0) target bundleno = 764 (0x2fc), region = 48  ;;  %s1688_s10 = sand.u32 (!%p1591_p0), 1, %s1452_s25  }
  0x65   : > { %s1060_s8 = sshll.u32 (!%p1591_p0), %s1688_s10, 7  ;;  %s320_s19 = scalar_lea.sflag (!%p1591_p0), [#allocation4], %s1688_s10 }
  0x66   : > { %s1692_s11 = scalar_lea.vmem (!%p1591_p0), [#allocation3], %s1060_s8 }
  0x69   : > { %1431 = dma.done.wait (%p1574_p8), %s320_s19, 2048  }
  0x6a   : > { %1433 = vsyncadd (%p1574_p8), %s320_s19, 4294965248 }
  0x6b   : > { %1435 = dma.done.wait (%p1566_p5), [#allocation7], 1280  }
  0x6c   : > { %1437 = vsyncadd (%p1566_p5), [#allocation7], 4294966016 }
  0x6d   : > { %1439 = dma.done.wait (%p1566_p5), [#allocation10], 1024  }
  0x6e   : > { %1441 = vsyncadd (%p1566_p5), [#allocation10], 4294966272  ;;  %vm378_vm0 = vcmask 261120   ;;  %v404_v0 = vlaneseq  ;;  %v1478_v1 = vmov 0.0   ;;  %vm1479_vm1 = vmmov 0   ;;  %v1258_v3 = vld [vmem:[#allocation6 + $0x8] sm:$0xff]  }
  0x6f   : > { %1117 = vmatprep.subr.bf16.mxu0 %v1478_v1  ;;  %1121 = vmatprep.mubr.msk.bf16.mxu0 %vm1479_vm1, %v1478_v1  ;;  %379 = vst.msk [vmem:[#allocation2] sm:$0xff] %vm378_vm0, %v1478_v1  ;;  %380 = vst.msk [vmem:[#allocation2 + $0x8] sm:$0xff] %vm378_vm0, %v1478_v1  ;;  %v1259_v5 = vld [vmem:[#allocation6] sm:$0xff]   ;;  %v396_v7 = vld [vmem:[%s1692_s11 + $0x10] sm:$0xff]  ;;  %vm621_vm3 = vcmask 1041409   ;;  %vm623_vm4 = vcmask 1042434  }
  0x70   : > { %381 = vst.msk [vmem:[#allocation2 + $0x10] sm:$0xff] %vm378_vm0, %v1478_v1  ;;  %382 = vst.msk [vmem:[#allocation2 + $0x18] sm:$0xff] %vm378_vm0, %v1478_v1  ;;  %1125 = vmatprep.subr.bf16.mxu1 %v1478_v1  ;;  %1141 = vmatprep.mubr.msk.bf16.mxu1 %vm1479_vm1, %v1478_v1  ;;  %v405_v2 = vshrl.u32 %v404_v0, 7  ;;  %v395_v6 = vld [vmem:[%s1692_s11] sm:$0xff]  ;;  %v398_v9 = vld [vmem:[%s1692_s11 + $0x30] sm:$0xff]  ;;  %vm625_vm5 = vcmask 1043459  }
  0x71   : > { %383 = vst.msk [vmem:[#allocation2 + $0x20] sm:$0xff] %vm378_vm0, %v1478_v1  ;;  %384 = vst.msk [vmem:[#allocation2 + $0x28] sm:$0xff] %vm378_vm0, %v1478_v1  ;;  %1118 = vmatpush3.bf16.msra.mxu0 %v1258_v3  ;;  %v397_v8 = vld [vmem:[%s1692_s11 + $0x20] sm:$0xff]  ;;  %v400_v11 = vld [vmem:[%s1692_s11 + $0x50] sm:$0xff]  ;;  %vm627_vm6 = vcmask 1044484   ;;  %vm629_vm7 = vcmask 1045509  }
  0x72   : > { %385 = vst.msk [vmem:[#allocation2 + $0x30] sm:$0xff] %vm378_vm0, %v1478_v1  ;;  %386 = vst.msk [vmem:[#allocation2 + $0x38] sm:$0xff] %vm378_vm0, %v1478_v1  ;;  %v429_v4 = vadd.s32 8, %v405_v2  ;;  %1119 = vmatprep.subr.bf16.mxu0 %v1478_v1  ;;  %v399_v10 = vld [vmem:[%s1692_s11 + $0x40] sm:$0xff]  ;;  %v402_v15 = vld [vmem:[%s1692_s11 + $0x70] sm:$0xff]  ;;  %vm631_vm8 = vcmask 1046534  }
  0x73   : > { %v401_v14 = vld [vmem:[%s1692_s11 + $0x60] sm:$0xff]  ;;  %v419_v16 = vld [vmem:[%s1692_s11 + $0x8] sm:$0xff]  ;;  %v420_v17 = vld [vmem:[%s1692_s11 + $0x18] sm:$0xff]  ;;  %vm633_vm9 = vcmask 1047559   ;;  %s1064_s13 = sshll.u32 %s1688_s10, 3  ;;  %s1088_s20 = sshll.u32 %s1460_s27, 7 }
  0x74   : > { %vm430_vm2 = vcmp.lt.s32.totalorder %v429_v4, 12  ;;  %v421_v22 = vld [vmem:[%s1692_s11 + $0x28] sm:$0xff]  ;;  %v422_v23 = vld [vmem:[%s1692_s11 + $0x38] sm:$0xff]  ;;  %v1261_v49 = vld [vmem:[#allocation8 + $0x30] sm:$0xff]   ;;  %s365_s9 = scalar_lea.vmem [#allocation11], %s1064_s13  ;;  %s1805_s19 = scalar_lea.hbm %s1860_s7, %s1088_s20 }
  0x75   : > { %1120 = vmatpush3.bf16.msra.mxu0 %v1259_v5  ;;  %v423_v24 = vld [vmem:[%s1692_s11 + $0x48] sm:$0xff]  ;;  %v433_v25 = vsel %vm430_vm2, %v419_v16, 0.0  ;;  %v434_v26 = vsel %vm430_vm2, %v420_v17, 0.0  ;;  %v424_v29 = vld [vmem:[%s1692_s11 + $0x58] sm:$0xff]  ;;  %v435_v32 = vsel %vm430_vm2, %v421_v22, 0.0  ;;  %v436_v33 = vsel %vm430_vm2, %v422_v23, 0.0 }
  0x76   : > { %v387_v12 = vld [vmem:[#allocation2] sm:$0xff]  ;;  %v388_v13 = vld [vmem:[#allocation2 + $0x8] sm:$0xff]  ;;  %1145 = vmatprep.subr.bf16.mxu0 %v1478_v1  ;;  %v426_v31 = vld [vmem:[%s1692_s11 + $0x78] sm:$0xff]  ;;  %v437_v34 = vsel %vm430_vm2, %v423_v24, 0.0  ;;  %v441_v35 = vadd.f32 %v433_v25, %v395_v6  ;;  %v438_v36 = vsel %vm430_vm2, %v424_v29, 0.0  ;;  %v442_v39 = vadd.f32 %v434_v26, %v396_v7  ;;  %s932_s22 = sshll.u32 %s365_s9, 4  ;;  %s1807_s22 = int_to_ptr.vmem [resolvable:$true] %s932_s22 }
  0x77   : > { %v389_v18 = vld [vmem:[#allocation2 + $0x10] sm:$0xff]  ;;  %v390_v19 = vld [vmem:[#allocation2 + $0x18] sm:$0xff]  ;;  %v425_v30 = vld [vmem:[%s1692_s11 + $0x68] sm:$0xff]  ;;  %v440_v38 = vsel %vm430_vm2, %v426_v31, 0.0  ;;  %v443_v41 = vadd.f32 %v435_v32, %v397_v8  ;;  %v444_v42 = vadd.f32 %v436_v33, %v398_v9  ;;  %v445_v43 = vadd.f32 %v437_v34, %v399_v10  ;;  %s919_s11 = scalar_lea.sflag [#allocation5], %s1688_s10  ;;  %s1380_s12 = scalar_lea.vmem %s1807_s22, 128 }
  0x78   : > { %v391_v20 = vld [vmem:[#allocation2 + $0x20] sm:$0xff]  ;;  %v392_v21 = vld [vmem:[#allocation2 + $0x28] sm:$0xff]  ;;  %v439_v37 = vsel %vm430_vm2, %v425_v30, 0.0  ;;  %v446_v44 = vadd.f32 %v438_v36, %v400_v11  ;;  %v448_v46 = vadd.f32 %v440_v38, %v402_v15  ;;  %v449_v47 = vadd.f32 %v441_v35, %v387_v12  ;;  %v1262_v56 = vld [vmem:[#allocation8 + $0x28] sm:$0xff]   ;;  %p1381_p5 = scmp.ne.s32.totalorder %s1807_s22, %s1380_s12  ;;  %p1873_p8 = scmp.ne.s32.totalorder %s1868_s15, 0 }
  0x79   : > { %v393_v27 = vld [vmem:[#allocation2 + $0x30] sm:$0xff]  ;;  %v394_v28 = vld [vmem:[#allocation2 + $0x38] sm:$0xff]  ;;  %v1260_v40 = vld [vmem:[#allocation8 + $0x38] sm:$0xff]   ;;  %v447_v45 = vadd.f32 %v439_v37, %v401_v14  ;;  %v450_v48 = vadd.f32 %v442_v39, %v388_v13  ;;  %v451_v50 = vadd.f32 %v443_v41, %v389_v18  ;;  %v452_v51 = vadd.f32 %v444_v42, %v390_v19  ;;  %s1480_s27 = smov [#allocation11]  }
  0x7a   : > { %1126 = vmatpush3.bf16.msra.mxu1 %v1260_v40  ;;  %v453_v52 = vadd.f32 %v445_v43, %v391_v20  ;;  %v454_v53 = vadd.f32 %v446_v44, %v392_v21  ;;  %v456_v55 = vadd.f32 %v448_v46, %v394_v28  ;;  %457 = vst.msk [vmem:[#allocation2] sm:$0xff] %vm378_vm0, %v449_v47  ;;  %v1263_v57 = vld [vmem:[#allocation8 + $0x20] sm:$0xff]   ;;  %v1264_v2 = vld [vmem:[#allocation8 + $0x18] sm:$0xff]   ;;  %v1265_v29 = vld [vmem:[#allocation8 + $0x10] sm:$0xff]   ;;  %p1382_p0 = pnand %p1381_p5, %p1873_p8  ;;  %s1384_s14 = sshll.u32 %s1480_s27, 4  ;;  %s1385_s14 = int_to_ptr.vmem [resolvable:$false] %s1384_s14 }
  0x7b   : > { %1127 = vmatprep.subr.bf16.mxu1 %v1478_v1  ;;  %v455_v54 = vadd.f32 %v447_v45, %v393_v27  ;;  %458 = vst.msk [vmem:[#allocation2 + $0x8] sm:$0xff] %vm378_vm0, %v450_v48  ;;  %459 = vst.msk [vmem:[#allocation2 + $0x10] sm:$0xff] %vm378_vm0, %v451_v50  ;;  %s1386_s18 = scalar_lea.vmem %s1385_s14, 256  ;;  %p1387_p4 = scmp.lt.s32.totalorder %s1807_s22, %s1385_s14 }
  0x7c   : > { %460 = vst.msk [vmem:[#allocation2 + $0x18] sm:$0xff] %vm378_vm0, %v452_v51  ;;  %461 = vst.msk [vmem:[#allocation2 + $0x20] sm:$0xff] %vm378_vm0, %v453_v52  ;;  %p1383_p1 = pneg %p1382_p0  ;;  %p1388_p6 = scmp.lt.s32.totalorder %s1386_s18, %s1380_s12 }
  0x7d   : > { %462 = vst.msk [vmem:[#allocation2 + $0x28] sm:$0xff] %vm378_vm0, %v454_v53  ;;  %463 = vst.msk [vmem:[#allocation2 + $0x30] sm:$0xff] %vm378_vm0, %v455_v54 }
  0x7e   : > { %464 = vst.msk [vmem:[#allocation2 + $0x38] sm:$0xff] %vm378_vm0, %v456_v55  ;;  %1128 = vmatpush3.bf16.msra.mxu1 %v1261_v49  ;;  %p1389_p7 = por %p1388_p6, %p1387_p4 }
  0x7f   : > { %1129 = vmatprep.subr.bf16.mxu1 %v1478_v1 }
  0x80   : > { %p1390_p12 = pnand %p1389_p7, %p1383_p1 }
  0x81   : > { %v521_v58 = vld [vmem:[#allocation2] sm:$0xff] }
  0x82   : > { %1130 = vmatpush3.bf16.msra.mxu1 %v1262_v56  ;;  %v522_v59 = vld [vmem:[#allocation2 + $0x8] sm:$0xff]  ;;  %v523_v60 = vld [vmem:[#allocation2 + $0x10] sm:$0xff]  ;;  %v530_v63 = vsel %vm378_vm0, %v521_v58, 0.0 }
  0x83   : > { %1131 = vmatprep.subr.bf16.mxu1 %v1478_v1  ;;  %v524_v61 = vld [vmem:[#allocation2 + $0x18] sm:$0xff]  ;;  %v525_v62 = vld [vmem:[#allocation2 + $0x20] sm:$0xff]  ;;  %v537_v0 = vsel %vm378_vm0, %v522_v59, 0.0  ;;  %v531_v6 = vrot.slane %v530_v63, 4  ;;  %v544_v8 = vsel %vm378_vm0, %v523_v60, 0.0 }
  0x84   : > { %v526_v3 = vld [vmem:[#allocation2 + $0x28] sm:$0xff]  ;;  %v527_v4 = vld [vmem:[#allocation2 + $0x30] sm:$0xff]  ;;  %v538_v7 = vrot.slane %v537_v0, 4  ;;  %v545_v9 = vrot.slane %v544_v8, 4  ;;  %v551_v10 = vsel %vm378_vm0, %v524_v61, 0.0  ;;  %v558_v11 = vsel %vm378_vm0, %v525_v62, 0.0 }
  0x85   : > { %v528_v5 = vld [vmem:[#allocation2 + $0x38] sm:$0xff]  ;;  %v565_v12 = vsel %vm378_vm0, %v526_v3, 0.0  ;;  %v532_v13 = vadd.f32 %v531_v6, %v530_v63  ;;  %v552_v15 = vrot.slane %v551_v10, 4  ;;  %v559_v16 = vrot.slane %v558_v11, 4 }
  0x86   : > { %1132 = vmatpush3.bf16.msra.mxu1 %v1263_v57  ;;  %v539_v14 = vadd.f32 %v538_v7, %v537_v0  ;;  %v546_v17 = vadd.f32 %v545_v9, %v544_v8  ;;  %v566_v18 = vrot.slane %v565_v12, 4  ;;  %v572_v19 = vsel %vm378_vm0, %v527_v4, 0.0 }
  0x87   : > { %1133 = vmatprep.subr.bf16.mxu1 %v1478_v1  ;;  %v579_v20 = vsel %vm378_vm0, %v528_v5, 0.0  ;;  %v533_v21 = vrot.slane %v532_v13, 2  ;;  %v553_v23 = vadd.f32 %v552_v15, %v551_v10  ;;  %v560_v24 = vadd.f32 %v559_v16, %v558_v11 }
  0x88   : > { %v540_v22 = vrot.slane %v539_v14, 2  ;;  %v547_v25 = vrot.slane %v546_v17, 2  ;;  %v567_v26 = vadd.f32 %v566_v18, %v565_v12  ;;  %v573_v27 = vrot.slane %v572_v19, 4 }
  0x89   : > { %v580_v28 = vrot.slane %v579_v20, 4  ;;  %v534_v30 = vadd.f32 %v533_v21, %v532_v13  ;;  %v554_v32 = vrot.slane %v553_v23, 2  ;;  %v561_v33 = vrot.slane %v560_v24, 2 }
  0x8a   : > { %1134 = vmatpush3.bf16.msra.mxu1 %v1264_v2  ;;  %v541_v31 = vadd.f32 %v540_v22, %v539_v14  ;;  %v548_v34 = vadd.f32 %v547_v25, %v546_v17  ;;  %v568_v35 = vrot.slane %v567_v26, 2  ;;  %v574_v36 = vadd.f32 %v573_v27, %v572_v19  ;;  %v1266_v22 = vld [vmem:[#allocation8 + $0x8] sm:$0xff]   ;;  %v1269_v25 = vld [vmem:[#allocation9 + $0x30] sm:$0xff]   ;;  %v1271_v27 = vld [vmem:[#allocation9 + $0x20] sm:$0xff]  }
  0x8b   : > { %1135 = vmatprep.subr.bf16.mxu1 %v1478_v1  ;;  %v581_v37 = vadd.f32 %v580_v28, %v579_v20  ;;  %v535_v38 = vrot.slane %v534_v30, 1  ;;  %v555_v40 = vadd.f32 %v554_v32, %v553_v23  ;;  %v562_v41 = vadd.f32 %v561_v33, %v560_v24  ;;  %v1267_v23 = vld [vmem:[#allocation8] sm:$0xff]   ;;  %v1268_v24 = vld [vmem:[#allocation9 + $0x38] sm:$0xff]  }
  0x8c   : > { %v542_v39 = vrot.slane %v541_v31, 1  ;;  %v549_v42 = vrot.slane %v548_v34, 1  ;;  %v569_v43 = vadd.f32 %v568_v35, %v567_v26  ;;  %v575_v44 = vrot.slane %v574_v36, 2  ;;  %v1270_v26 = vld [vmem:[#allocation9 + $0x28] sm:$0xff]   ;;  %v1272_v28 = vld [vmem:[#allocation9 + $0x18] sm:$0xff]  }
  0x8d   : > { %v582_v45 = vrot.slane %v581_v37, 2  ;;  %v536_v46 = vadd.f32 %v535_v38, %v534_v30  ;;  %v556_v48 = vrot.slane %v555_v40, 1  ;;  %v563_v49 = vrot.slane %v562_v41, 1  ;;  %v1065_v30 = vld [vmem:[%s1855_s2] ss:$0 sm:$0xff]  ;;  %v1274_v38 = vld [vmem:[#allocation9 + $0x8] sm:$0xff]  }
  0x8e   : > { %1136 = vmatpush3.bf16.msra.mxu1 %v1265_v29  ;;  %v543_v47 = vadd.f32 %v542_v39, %v541_v31  ;;  %v550_v50 = vadd.f32 %v549_v42, %v548_v34  ;;  %v570_v51 = vrot.slane %v569_v43, 1  ;;  %v576_v52 = vadd.f32 %v575_v44, %v574_v36  ;;  %v1273_v29 = vld [vmem:[#allocation9 + $0x10] sm:$0xff]   ;;  %v1275_v39 = vld [vmem:[#allocation9] sm:$0xff]  }
  0x8f   : > { %1137 = vmatprep.subr.bf16.mxu1 %v1478_v1  ;;  %v583_v53 = vadd.f32 %v582_v45, %v581_v37  ;;  %v557_v54 = vadd.f32 %v556_v48, %v555_v40  ;;  %v564_v55 = vadd.f32 %v563_v49, %v562_v41  ;;  %v586_v56 = vpack.c.bf16 %v536_v46, %v536_v46  ;;  %v1069_v40 = vld [vmem:[%s1857_s4] ss:$0 sm:$0xff] }
  0x90   : > { %v587_v57 = vpack.c.bf16 %v543_v47, %v543_v47  ;;  %v571_v58 = vadd.f32 %v570_v51, %v569_v43  ;;  %v577_v59 = vrot.slane %v576_v52, 1  ;;  %v588_v61 = vpack.c.bf16 %v550_v50, %v550_v50 }
  0x91   : > { %v584_v60 = vrot.slane %v583_v53, 1  ;;  %v589_v62 = vpack.c.bf16 %v557_v54, %v557_v54  ;;  %v590_v63 = vpack.c.bf16 %v564_v55, %v564_v55  ;;  %v613_v0 = vunpack.c.l.b16 %v586_v56 }
  0x92   : > { %v614_v2 = vunpack.c.l.b16 %v587_v57  ;;  %v578_v3 = vadd.f32 %v577_v59, %v576_v52  ;;  %v591_v5 = vpack.c.bf16 %v571_v58, %v571_v58  ;;  %v615_v6 = vunpack.c.l.b16 %v588_v61  ;;  %1138 = vmatpush3.bf16.msra.mxu1 %v1266_v22 }
  0x93   : > { %v585_v4 = vadd.f32 %v584_v60, %v583_v53  ;;  %v616_v7 = vunpack.c.l.b16 %v589_v62  ;;  %v617_v8 = vunpack.c.l.b16 %v590_v63  ;;  %1139 = vmatprep.subr.bf16.mxu1 %v1478_v1 }
  0x94   : > { %v622_v9 = vsel %vm621_vm3, %v614_v2, %v613_v0  ;;  %v592_v10 = vpack.c.bf16 %v578_v3, %v578_v3  ;;  %v618_v12 = vunpack.c.l.b16 %v591_v5 }
  0x95   : > { %v593_v11 = vpack.c.bf16 %v585_v4, %v585_v4  ;;  %v624_v13 = vsel %vm623_vm4, %v615_v6, %v622_v9 }
  0x96   : > { %v626_v14 = vsel %vm625_vm5, %v616_v7, %v624_v13  ;;  %v619_v15 = vunpack.c.l.b16 %v592_v10  ;;  %1140 = vmatpush3.bf16.msra.mxu1 %v1267_v23 }
  0x97   : > { %v620_v16 = vunpack.c.l.b16 %v593_v11  ;;  %v628_v17 = vsel %vm627_vm6, %v617_v8, %v626_v14 }
  0x98   : > { %v630_v18 = vsel %vm629_vm7, %v618_v12, %v628_v17 }
  0x99   : > { %v632_v19 = vsel %vm631_vm8, %v619_v15, %v630_v18 }
  0x9a   : > { %v634_v20 = vsel %vm633_vm9, %v620_v16, %v632_v19 }
  0x9b   : > { %v635_v21 = vpack.c.b16 %v634_v20, %v634_v20 }
  0x9d   : > { %1122 = vmatmul.mubr.msk.bf16.vlgmr.msra.gmra.mxu0 %vm378_vm0, %v635_v21 }
  0x9e   : > { %1161 = vmatprep.mubr.msk.bf16.mxu0 %vm1479_vm1, %v1478_v1  ;;  %1146 = vmatpush3.bf16.msra.mxu0 %v1268_v24 }
  0x9f   : > { %1147 = vmatprep.subr.bf16.mxu0 %v1478_v1 }
  0xa2   : > { %1148 = vmatpush3.bf16.msra.mxu0 %v1269_v25 }
  0xa3   : > { %1149 = vmatprep.subr.bf16.mxu0 %v1478_v1 }
  0xa6   : > { %1150 = vmatpush3.bf16.msra.mxu0 %v1270_v26 }
  0xa7   : > { %1151 = vmatprep.subr.bf16.mxu0 %v1478_v1 }
  0xaa   : > { %1152 = vmatpush3.bf16.msra.mxu0 %v1271_v27 }
  0xab   : > { %1153 = vmatprep.subr.bf16.mxu0 %v1478_v1 }
  0xae   : > { %1154 = vmatpush3.bf16.msra.mxu0 %v1272_v28 }
  0xaf   : > { %1155 = vmatprep.subr.bf16.mxu0 %v1478_v1 }
  0xb2   : > { %1156 = vmatpush3.bf16.msra.mxu0 %v1273_v29 }
  0xb3   : > { %1157 = vmatprep.subr.bf16.mxu0 %v1478_v1 }
  0xb6   : > { %1158 = vmatpush3.bf16.msra.mxu0 %v1274_v38 }
  0xb7   : > { %1159 = vmatprep.subr.bf16.mxu0 %v1478_v1  ;;  %v1078_v1 = vld [vmem:[%s1859_s6] ss:$0 sm:$0xff] }
  0xba   : > { %1160 = vmatpush3.bf16.msra.mxu0 %v1275_v39 }
 0x15d   : > { %v685_v31 = vpop.f32.mrf.mxu0 }
 0x15e   : > { %v686_v32 = vadd.f32 %v1065_v30, %v685_v31 }
 0x15f   : > { %v1123_v33 = vpop.f32.mrf.mxu0 }
 0x160   : > { %v691_v34 = vmax.f32 %v686_v32, 0.0 }
 0x161   : > { %v688_v35 = vpop.f32.mrf.mxu0 }
 0x162   : > { %v692_v36 = vpack.c.bf16 %v691_v34, %v691_v34 }
 0x163   : > { %v1124_v37 = vpop.f32.mrf.mxu0 }
 0x164   : > { %1142 = vmatmul.mubr.bf16.vlgmr.msra.gmra.mxu1 %v692_v36 }
 0x224   : > { %v798_v41 = vpop.f32.mrf.mxu1 }
 0x225   : > { %v799_v42 = vadd.f32 %v1069_v40, %v798_v41 }
 0x226   : > { %v1143_v43 = vpop.f32.mrf.mxu1 }
 0x227   : > { %v804_v44 = vmax.f32 %v799_v42, 0.0 }
 0x228   : > { %v801_v45 = vpop.f32.mrf.mxu1 }
 0x229   : > { %v805_v46 = vpack.c.bf16 %v804_v44, %v804_v44 }
 0x22a   : > { %v1144_v47 = vpop.f32.mrf.mxu1 }
 0x22b   : > { %1162 = vmatmul.mubr.bf16.vlgmr.msra.gmra.mxu0 %v805_v46 }
 0x2eb   : > { %v911_v48 = vpop.f32.mrf.mxu0 }
 0x2ec   : > { %v912_v49 = vadd.f32 %v1078_v1, %v911_v48 }
 0x2ed   : > { %v1163_v50 = vpop.f32.mrf.mxu0 }
 0x2ee   : > { %917 = vst [vmem:[%s365_s9] sm:$0xff] %v912_v49 }
 0x2ef   : > { %v914_v51 = vpop.f32.mrf.mxu0 }
 0x2f0   : > { %1393 = shalt.err (!%p1390_p12)
}
 0x2f1   : > { %s1394_s23 = scalar_lea.hbm %s1805_s19, 128  ;;  %s1398_s16 = scalar_lea.hbm %s1860_s7, 256 }
 0x2f2   : > { %p1395_p11 = scmp.ne.s32.totalorder %s1805_s19, %s1394_s23  ;;  %p1399_p9 = scmp.lt.s32.totalorder %s1805_s19, %s1860_s7 }
 0x2f3   : > { %p1400_p2 = scmp.lt.s32.totalorder %s1398_s16, %s1394_s23 }
 0x2f4   : > { %p1396_p10 = pnand %p1395_p11, %p1873_p8 }
 0x2f5   : > { %p1401_p3 = por %p1400_p2, %p1399_p9 }
 0x2f6   : > { %p1397_p13 = pneg %p1396_p10 }
 0x2f8   : > { %p1402_p5 = pnand %p1401_p3, %p1397_p13 }
 0x2fa   : > { %1405 = shalt.err (!%p1402_p5)
}
 0x2fb   : > { %1178 = dma.vmem_to_hbm [thread:$0]  (%p1873_p8), %s1807_s22, 128, %s1805_s19, %s919_s11   ;;  %v1164_v52 = vpop.f32.mrf.mxu0 }
 0x2fc PF: > { %s944_s9 = sand.u32 1, %s1448_s24   ;;  %p1874_p0 = scmp.ne.s32.totalorder %s1870_s17, 0 }
 0x2fd   : > { %p1875_p1 = scmp.ge.s32.totalorder %s1468_s29, 2  ;;  %s945_s30 = scalar_lea.sflag [#allocation5], %s944_s9 }
 0x2ff   : > { %p1191_p4 = pnand %p1875_p1, %p1874_p0 }
 0x301   : > { %p1192_p6 = pneg %p1191_p4 }
 0x303   : > { %1443 = dma.done.wait (%p1192_p6), %s945_s30, 128  }
 0x304   : > { %1445 = vsyncadd (%p1192_p6), %s945_s30, 4294967168  ;;  %s25_s29 = sadd.s32 1, %s1468_s29   ;;  %s1876_s15 = sld [smem:[#allocation17_spill]] }
 0x305   : > { %p22_p7 = scmp.ge.s32.totalorder %s25_s29, 4   ;;  %s1877_s22 = sld [smem:[#allocation16_spill]] }
 0x306   : > { %s1878_s24 = smov %s1452_s25  ;;  %s1879_s25 = smov %s1456_s26 }
 0x307   : > { %s1881_s27 = smov %s1464_s28  ;;  %24 = sbr.rel (!%p22_p7) target bundleno = 8 (0x8), region = 117 }
 0x30a   : > { %s1880_s26 = smov %s1876_s15 }
 0x30b   : > { %s1882_s28 = smov %s1877_s22 }
 0x30c   :  { %950 = vsyncpa [#allocation4], 1 }
 0x30d   :  { %952 = vsyncpa [#allocation4 + $0x1], 1 }
 0x30e   :  { %953 = vsyncpa [#allocation7], 1 }
 0x30f   :  { %954 = vsyncpa [#allocation10], 1 }
 0x310   :  { %955 = vsyncpa [#allocation5], 1 }
 0x311   :  { %957 = vsyncpa [#allocation5 + $0x1], 1 }

// kernel: tpu_custom_call.1
= control target key start
LH: loop header
LB: loop body
LE: loop exit
PB: predicated region body
PF: predicated region fallthrough
CT: control target
= control target key end

     0   :  { %12 = vsyncpa [#allocation4], 0  ;;  %s1853_s0 = inlined_call_operand.hbm [shape: f32[10,12,32], index: 0, kind: input, shape index: {}]   ;;  %s1854_s1 = inlined_call_operand.hbm [shape: bf16[32,128], index: 1, kind: input, shape index: {}]   ;;  %s1855_s2 = inlined_call_operand.vmem [shape: f32[1,128], index: 2, kind: input, shape index: {}]   ;;  %s1856_s3 = inlined_call_operand.hbm [shape: bf16[128,128], index: 3, kind: input, shape index: {}]   ;;  %s1857_s4 = inlined_call_operand.vmem [shape: f32[1,128], index: 4, kind: input, shape index: {}]   ;;  %s1858_s5 = inlined_call_operand.hbm [shape: bf16[128,128], index: 5, kind: input, shape index: {}]   ;;  %s1859_s6 = inlined_call_operand.vmem [shape: f32[1,128], index: 6, kind: input, shape index: {}]   ;;  %s1860_s7 = inlined_call_operand.hbm [shape: f32[10,128], index: 7, kind: output, shape index: {}]  }
   0x1   :  { %14 = vsyncpa [#allocation4 + $0x1], 0 }
   0x2   :  { %15 = vsyncpa [#allocation7], 0 }
   0x3   :  { %16 = vsyncpa [#allocation10], 0 }
   0x4   :  { %17 = vsyncpa [#allocation5], 0 }
   0x5   :  { %19 = vsyncpa [#allocation5 + $0x1], 0  ;;  %s1521_s24 = smov 0   ;;  %s1523_s25 = smov 0  }
   0x6   :  { %s1525_s26 = smov 0   ;;  %s1527_s27 = smov 0  }
   0x7   :  { %s1529_s28 = smov 0   ;;  %s1531_s29 = smov 0  }
   0x8 LB: > { %s1042_s30 = sadd.s32 4294967295, %s1468_s29   ;;  %s1043_s8 = sadd.s32 4294967294, %s1468_s29   ;;  %s1468_s29 = sphi %s1531_s29, %s25_s29   ;;  %s1464_s28 = sphi %s1529_s28, %s1882_s28   ;;  %s1460_s27 = sphi %s1527_s27, %s1881_s27   ;;  %s1456_s26 = sphi %s1525_s26, %s1880_s26   ;;  %s1452_s25 = sphi %s1523_s25, %s1879_s25   ;;  %s1448_s24 = sphi %s1521_s24, %s1878_s24  }
   0x9   : > { %s37_s9 = sadd.s32 1, %s1464_s28  ;;  %s46_s10 = sadd.s32 1, %s1456_s26 }
   0xa   : > { %p39_p0 = scmp.ge.s32.totalorder %s37_s9, 2  ;;  %p53_p1 = scmp.ne.s32.totalorder %s1456_s26, %s1452_s25 }
   0xb   : > { %p54_p2 = scmp.eq.s32.totalorder %s1468_s29, 0  ;;  %p59_p3 = scmp.ne.s32.totalorder %s1452_s25, %s1448_s24 }
   0xc   : > { %s1884_s9 = smov (%p39_p0, %s37_s9), 0  ;;  %p1566_p5 = scmp.eq.s32.totalorder %s1042_s30, 0 }
   0xd   : > { %1864 = sst [smem:[#allocation16_spill]] %s1884_s9  ;;  %p1562_p4 = por %p54_p2, %p53_p1 }
   0xe   : > { %s41_s13 = ssub.s32 %s1464_s28, %s1884_s9  ;;  %p209_p6 = scmp.eq.s32.totalorder %s1042_s30, 1 }
   0xf   : > { %p44_p7 = scmp.eq.s32.totalorder %s41_s13, 0  ;;  %p1574_p8 = por %p1566_p5, %p59_p3 }
  0x10   : > { %p1578_p9 = por %p209_p6, %p53_p1  ;;  %p215_p10 = scmp.eq.s32.totalorder %s1043_s8, 1 }
  0x11   : > { %s1583_s16 = scalar_select %p44_p7, %s1456_s26, %s46_s10  }
  0x12   : > { %s1868_s15 = scalar_select %p1578_p9, 1, 0 }
  0x13   : > { %1869 = sst [smem:[#allocation17_spill]] %s1583_s16  ;;  %p1585_p11 = por %p215_p10, %p59_p3 }
  0x14   : > { %p1044_p12 = scmp.ge.s32.totalorder %s1468_s29, 1  ;;  %p222_p13 = scmp.lt.s32.totalorder %s1468_s29, 3 }
  0x15   : > { %s1870_s17 = scalar_select %p1585_p11, 1, 0 }
  0x16   : > { %p1591_p0 = pnand %p1044_p12, %p222_p13  ;;  %s1470_s19 = smov [#allocation6]  }
  0x17   : > { %s234_s20 = sshll.u32 %s1470_s19, 4  ;;  %s1471_s21 = smov [#allocation8]   ;;  %s235_s20 = int_to_ptr.vmem [resolvable:$true] %s234_s20 }
  0x18   : > { %p1180_p1 = pneg %p1591_p0  ;;  %s250_s22 = sshll.u32 %s1471_s21, 4  ;;  %s1603_s22 = int_to_ptr.vmem [resolvable:$true] %s250_s22 }
  0x19   : > { %s1472_s30 = smov [#allocation9]   ;;  %s1287_s10 = scalar_lea.vmem %s235_s20, 256 }
  0x1a   : > { %p1599_p2 = pnand %p1180_p1, %p1566_p5  ;;  %s266_s8 = sshll.u32 %s1472_s30, 4  ;;  %s1605_s8 = int_to_ptr.vmem [resolvable:$true] %s266_s8 }
  0x1b   : > { %p1288_p6 = scmp.ne.s32.totalorder %s235_s20, %s1287_s10  ;;  %p1295_p12 = scmp.lt.s32.totalorder %s235_s20, %s235_s20 }
  0x1c   : > { %p1278_p3 = pneg %p1599_p2  ;;  %p1296_p13 = scmp.lt.s32.totalorder %s1287_s10, %s1287_s10 }
  0x1e   : > { %p1290_p7 = pnand %p1288_p6, %p1278_p3  ;;  %p1297_p1 = por %p1296_p13, %p1295_p12 }
  0x20   : > { %p1291_p10 = pneg %p1290_p7 }
  0x22   : > { %p1298_p11 = pnand %p1297_p1, %p1291_p10 }
  0x24   : > { %1301 = shalt.err (!%p1298_p11)
}
  0x25   : > { %s1473_s13 = smov 64   ;;  %s1474_s19 = smov 4  }
  0x26   : > { %1183 = dma.hbm_to_vmem [thread:$0]  (!%p1599_p2), %s1854_s1, 256, %s235_s20, [#allocation7], %s1473_s13, %s1473_s13, %s1474_s19  }
  0x27   : > { %s1313_s9 = scalar_lea.vmem %s1603_s22, 1024  ;;  %p1321_p11 = scmp.lt.s32.totalorder %s1603_s22, %s1603_s22 }
  0x28   : > { %p1314_p6 = scmp.ne.s32.totalorder %s1603_s22, %s1313_s9  ;;  %p1322_p10 = scmp.lt.s32.totalorder %s1313_s9, %s1313_s9 }
  0x2a   : > { %p1316_p7 = pnand %p1314_p6, %p1278_p3  ;;  %p1323_p13 = por %p1322_p10, %p1321_p11 }
  0x2c   : > { %p1317_p12 = pneg %p1316_p7 }
  0x2e   : > { %p1324_p1 = pnand %p1323_p13, %p1317_p12 }
  0x30   : > { %1327 = shalt.err (!%p1324_p1)
}
  0x31   : > { %1186 = dma.hbm_to_vmem [thread:$0]  (!%p1599_p2), %s1856_s3, 1024, %s1603_s22, [#allocation7], %s1473_s13, %s1473_s13, %s1474_s19  }
  0x32   : > { %s1339_s20 = scalar_lea.vmem %s1605_s8, 1024  ;;  %p1347_p12 = scmp.lt.s32.totalorder %s1605_s8, %s1605_s8 }
  0x33   : > { %p1340_p6 = scmp.ne.s32.totalorder %s1605_s8, %s1339_s20  ;;  %p1348_p11 = scmp.lt.s32.totalorder %s1339_s20, %s1339_s20 }
  0x35   : > { %p1342_p7 = pnand %p1340_p6, %p1278_p3  ;;  %p1349_p10 = por %p1348_p11, %p1347_p12 }
  0x37   : > { %p1343_p9 = pneg %p1342_p7 }
  0x39   : > { %p1350_p13 = pnand %p1349_p10, %p1343_p9 }
  0x3b   : > { %1353 = shalt.err (!%p1350_p13)
}
  0x3c   : > { %1189 = dma.hbm_to_vmem [thread:$0]  (!%p1599_p2), %s1858_s5, 1024, %s1605_s8, [#allocation10], %s1473_s13, %s1473_s13, %s1474_s19  }
  0x3d   : > { %p1863_p1 = scmp.ge.s32.totalorder %s1468_s29, 2 }
  0x3f   : > { %279 = sbr.rel (%p1863_p1) target bundleno = 100 (0x64), region = 40 }
  0x44   : > { %282 = sbr.rel (!%p1562_p4) target bundleno = 100 (0x64), region = 44  ;;  %s283_s22 = sand.u32 (%p1562_p4), 1, %s1456_s26  }
  0x45   : > { %s1050_s21 = sshll.u32 (%p1562_p4), %s1464_s28, 3  ;;  %s1049_s30 = sshll.u32 (%p1562_p4), %s283_s22, 7 }
  0x46   : > { %s290_s10 = ssub.s32 (%p1562_p4), 10, %s1050_s21  ;;  %s1653_s13 = scalar_lea.sflag (%p1562_p4), [#allocation4], %s283_s22 }
  0x47   : > { %p291_p9 = scmp.lt.s32.totalorder (%p1562_p4), %s290_s10, 8  ;;  %s287_s19 = scalar_lea.vmem (%p1562_p4), [#allocation3], %s1049_s30 }
  0x49   : > { %s1886_s10 = smov (!%p291_p9, %s290_s10), 8 }
  0x4a   : > { %s1650_s23 = sshll.u32 %s1886_s10, 8 }
  0x4b   : > { %s296_s8 = ssub.s32 2048, %s1650_s23 }
  0x4c   : > { %297 = vsyncadd %s1653_s13, %s296_s8  ;;  %p1053_p4 = scmp.ne.s32.totalorder %s1650_s23, 0  ;;  %s1093_s11 = sshll.u32 %s1464_s28, 11 }
  0x4d   : > { %s1661_s16 = scalar_lea.hbm %s1853_s0, %s1093_s11  ;;  %s305_s21 = sshll.u32 %s287_s19, 4  ;;  %s1663_s21 = int_to_ptr.vmem [resolvable:$true] %s305_s21 }
  0x4e   : > { %s1354_s22 = scalar_lea.hbm %s1661_s16, %s1650_s23  ;;  %s1358_s8 = scalar_lea.hbm %s1853_s0, 2560 }
  0x4f   : > { %p1355_p2 = scmp.ne.s32.totalorder %s1661_s16, %s1354_s22  ;;  %p1360_p7 = scmp.lt.s32.totalorder %s1358_s8, %s1354_s22 }
  0x51   : > { %p1356_p3 = pnand %p1355_p2, %p1053_p4 }
  0x53   : > { %p1357_p6 = pneg %p1356_p3 }
  0x55   : > { %p1362_p12 = pnand %p1360_p7, %p1357_p6 }
  0x57   : > { %1365 = shalt.err (!%p1362_p12)
}
  0x58   : > { %s1366_s19 = scalar_lea.vmem %s1663_s21, %s1650_s23  ;;  %s1475_s11 = smov [#allocation3]  }
  0x59   : > { %p1367_p11 = scmp.ne.s32.totalorder %s1663_s21, %s1366_s19  ;;  %s1370_s20 = sshll.u32 %s1475_s11, 4  ;;  %s1371_s20 = int_to_ptr.vmem [resolvable:$false] %s1370_s20 }
  0x5a   : > { %s1372_s9 = scalar_lea.vmem %s1371_s20, 4096  ;;  %p1373_p9 = scmp.lt.s32.totalorder %s1663_s21, %s1371_s20 }
  0x5b   : > { %p1368_p10 = pnand %p1367_p11, %p1053_p4  ;;  %p1374_p2 = scmp.lt.s32.totalorder %s1372_s9, %s1366_s19 }
  0x5d   : > { %p1369_p13 = pneg %p1368_p10  ;;  %p1375_p3 = por %p1374_p2, %p1373_p9 }
  0x5f   : > { %p1376_p1 = pnand %p1375_p3, %p1369_p13 }
  0x61   : > { %1379 = shalt.err (!%p1376_p1)
}
  0x62   : > { %s1476_s22 = smov 128   ;;  %s1477_s30 = smov 8  }
  0x63   : > { %311 = dma.hbm_to_vmem [thread:$0]  (%p1053_p4), %s1661_s16, %s1650_s23, %s1663_s21, %s1653_s13, %s1476_s22, %s1476_s22, %s1477_s30  }
  0x64 PF: > { %317 = sbr.rel (%p1591_p0) target bundleno = 764 (0x2fc), region = 48  ;;  %s1688_s10 = sand.u32 (!%p1591_p0), 1, %s1452_s25  }
  0x65   : > { %s1060_s8 = sshll.u32 (!%p1591_p0), %s1688_s10, 7  ;;  %s320_s19 = scalar_lea.sflag (!%p1591_p0), [#allocation4], %s1688_s10 }
  0x66   : > { %s1692_s11 = scalar_lea.vmem (!%p1591_p0), [#allocation3], %s1060_s8 }
  0x69   : > { %1431 = dma.done.wait (%p1574_p8), %s320_s19, 2048  }
  0x6a   : > { %1433 = vsyncadd (%p1574_p8), %s320_s19, 4294965248 }
  0x6b   : > { %1435 = dma.done.wait (%p1566_p5), [#allocation7], 1280  }
  0x6c   : > { %1437 = vsyncadd (%p1566_p5), [#allocation7], 4294966016 }
  0x6d   : > { %1439 = dma.done.wait (%p1566_p5), [#allocation10], 1024  }
  0x6e   : > { %1441 = vsyncadd (%p1566_p5), [#allocation10], 4294966272  ;;  %vm378_vm0 = vcmask 261120   ;;  %v404_v0 = vlaneseq  ;;  %v1478_v1 = vmov 0.0   ;;  %vm1479_vm1 = vmmov 0   ;;  %v1258_v3 = vld [vmem:[#allocation6 + $0x8] sm:$0xff]  }
  0x6f   : > { %1117 = vmatprep.subr.bf16.mxu0 %v1478_v1  ;;  %1121 = vmatprep.mubr.msk.bf16.mxu0 %vm1479_vm1, %v1478_v1  ;;  %379 = vst.msk [vmem:[#allocation2] sm:$0xff] %vm378_vm0, %v1478_v1  ;;  %380 = vst.msk [vmem:[#allocation2 + $0x8] sm:$0xff] %vm378_vm0, %v1478_v1  ;;  %v1259_v5 = vld [vmem:[#allocation6] sm:$0xff]   ;;  %v396_v7 = vld [vmem:[%s1692_s11 + $0x10] sm:$0xff]  ;;  %vm621_vm3 = vcmask 1041409   ;;  %vm623_vm4 = vcmask 1042434  }
  0x70   : > { %381 = vst.msk [vmem:[#allocation2 + $0x10] sm:$0xff] %vm378_vm0, %v1478_v1  ;;  %382 = vst.msk [vmem:[#allocation2 + $0x18] sm:$0xff] %vm378_vm0, %v1478_v1  ;;  %1125 = vmatprep.subr.bf16.mxu1 %v1478_v1  ;;  %1141 = vmatprep.mubr.msk.bf16.mxu1 %vm1479_vm1, %v1478_v1  ;;  %v405_v2 = vshrl.u32 %v404_v0, 7  ;;  %v395_v6 = vld [vmem:[%s1692_s11] sm:$0xff]  ;;  %v398_v9 = vld [vmem:[%s1692_s11 + $0x30] sm:$0xff]  ;;  %vm625_vm5 = vcmask 1043459  }
  0x71   : > { %383 = vst.msk [vmem:[#allocation2 + $0x20] sm:$0xff] %vm378_vm0, %v1478_v1  ;;  %384 = vst.msk [vmem:[#allocation2 + $0x28] sm:$0xff] %vm378_vm0, %v1478_v1  ;;  %1118 = vmatpush3.bf16.msra.mxu0 %v1258_v3  ;;  %v397_v8 = vld [vmem:[%s1692_s11 + $0x20] sm:$0xff]  ;;  %v400_v11 = vld [vmem:[%s1692_s11 + $0x50] sm:$0xff]  ;;  %vm627_vm6 = vcmask 1044484   ;;  %vm629_vm7 = vcmask 1045509  }
  0x72   : > { %385 = vst.msk [vmem:[#allocation2 + $0x30] sm:$0xff] %vm378_vm0, %v1478_v1  ;;  %386 = vst.msk [vmem:[#allocation2 + $0x38] sm:$0xff] %vm378_vm0, %v1478_v1  ;;  %v429_v4 = vadd.s32 8, %v405_v2  ;;  %1119 = vmatprep.subr.bf16.mxu0 %v1478_v1  ;;  %v399_v10 = vld [vmem:[%s1692_s11 + $0x40] sm:$0xff]  ;;  %v402_v15 = vld [vmem:[%s1692_s11 + $0x70] sm:$0xff]  ;;  %vm631_vm8 = vcmask 1046534  }
  0x73   : > { %v401_v14 = vld [vmem:[%s1692_s11 + $0x60] sm:$0xff]  ;;  %v419_v16 = vld [vmem:[%s1692_s11 + $0x8] sm:$0xff]  ;;  %v420_v17 = vld [vmem:[%s1692_s11 + $0x18] sm:$0xff]  ;;  %vm633_vm9 = vcmask 1047559   ;;  %s1064_s13 = sshll.u32 %s1688_s10, 3  ;;  %s1088_s20 = sshll.u32 %s1460_s27, 7 }
  0x74   : > { %vm430_vm2 = vcmp.lt.s32.totalorder %v429_v4, 12  ;;  %v421_v22 = vld [vmem:[%s1692_s11 + $0x28] sm:$0xff]  ;;  %v422_v23 = vld [vmem:[%s1692_s11 + $0x38] sm:$0xff]  ;;  %v1261_v49 = vld [vmem:[#allocation8 + $0x30] sm:$0xff]   ;;  %s365_s9 = scalar_lea.vmem [#allocation11], %s1064_s13  ;;  %s1805_s19 = scalar_lea.hbm %s1860_s7, %s1088_s20 }
  0x75   : > { %1120 = vmatpush3.bf16.msra.mxu0 %v1259_v5  ;;  %v423_v24 = vld [vmem:[%s1692_s11 + $0x48] sm:$0xff]  ;;  %v433_v25 = vsel %vm430_vm2, %v419_v16, 0.0  ;;  %v434_v26 = vsel %vm430_vm2, %v420_v17, 0.0  ;;  %v424_v29 = vld [vmem:[%s1692_s11 + $0x58] sm:$0xff]  ;;  %v435_v32 = vsel %vm430_vm2, %v421_v22, 0.0  ;;  %v436_v33 = vsel %vm430_vm2, %v422_v23, 0.0 }
  0x76   : > { %v387_v12 = vld [vmem:[#allocation2] sm:$0xff]  ;;  %v388_v13 = vld [vmem:[#allocation2 + $0x8] sm:$0xff]  ;;  %1145 = vmatprep.subr.bf16.mxu0 %v1478_v1  ;;  %v426_v31 = vld [vmem:[%s1692_s11 + $0x78] sm:$0xff]  ;;  %v437_v34 = vsel %vm430_vm2, %v423_v24, 0.0  ;;  %v441_v35 = vadd.f32 %v433_v25, %v395_v6  ;;  %v438_v36 = vsel %vm430_vm2, %v424_v29, 0.0  ;;  %v442_v39 = vadd.f32 %v434_v26, %v396_v7  ;;  %s932_s22 = sshll.u32 %s365_s9, 4  ;;  %s1807_s22 = int_to_ptr.vmem [resolvable:$true] %s932_s22 }
  0x77   : > { %v389_v18 = vld [vmem:[#allocation2 + $0x10] sm:$0xff]  ;;  %v390_v19 = vld [vmem:[#allocation2 + $0x18] sm:$0xff]  ;;  %v425_v30 = vld [vmem:[%s1692_s11 + $0x68] sm:$0xff]  ;;  %v440_v38 = vsel %vm430_vm2, %v426_v31, 0.0  ;;  %v443_v41 = vadd.f32 %v435_v32, %v397_v8  ;;  %v444_v42 = vadd.f32 %v436_v33, %v398_v9  ;;  %v445_v43 = vadd.f32 %v437_v34, %v399_v10  ;;  %s919_s11 = scalar_lea.sflag [#allocation5], %s1688_s10  ;;  %s1380_s12 = scalar_lea.vmem %s1807_s22, 128 }
  0x78   : > { %v391_v20 = vld [vmem:[#allocation2 + $0x20] sm:$0xff]  ;;  %v392_v21 = vld [vmem:[#allocation2 + $0x28] sm:$0xff]  ;;  %v439_v37 = vsel %vm430_vm2, %v425_v30, 0.0  ;;  %v446_v44 = vadd.f32 %v438_v36, %v400_v11  ;;  %v448_v46 = vadd.f32 %v440_v38, %v402_v15  ;;  %v449_v47 = vadd.f32 %v441_v35, %v387_v12  ;;  %v1262_v56 = vld [vmem:[#allocation8 + $0x28] sm:$0xff]   ;;  %p1381_p5 = scmp.ne.s32.totalorder %s1807_s22, %s1380_s12  ;;  %p1873_p8 = scmp.ne.s32.totalorder %s1868_s15, 0 }
  0x79   : > { %v393_v27 = vld [vmem:[#allocation2 + $0x30] sm:$0xff]  ;;  %v394_v28 = vld [vmem:[#allocation2 + $0x38] sm:$0xff]  ;;  %v1260_v40 = vld [vmem:[#allocation8 + $0x38] sm:$0xff]   ;;  %v447_v45 = vadd.f32 %v439_v37, %v401_v14  ;;  %v450_v48 = vadd.f32 %v442_v39, %v388_v13  ;;  %v451_v50 = vadd.f32 %v443_v41, %v389_v18  ;;  %v452_v51 = vadd.f32 %v444_v42, %v390_v19  ;;  %s1480_s27 = smov [#allocation11]  }
  0x7a   : > { %1126 = vmatpush3.bf16.msra.mxu1 %v1260_v40  ;;  %v453_v52 = vadd.f32 %v445_v43, %v391_v20  ;;  %v454_v53 = vadd.f32 %v446_v44, %v392_v21  ;;  %v456_v55 = vadd.f32 %v448_v46, %v394_v28  ;;  %457 = vst.msk [vmem:[#allocation2] sm:$0xff] %vm378_vm0, %v449_v47  ;;  %v1263_v57 = vld [vmem:[#allocation8 + $0x20] sm:$0xff]   ;;  %v1264_v2 = vld [vmem:[#allocation8 + $0x18] sm:$0xff]   ;;  %v1265_v29 = vld [vmem:[#allocation8 + $0x10] sm:$0xff]   ;;  %p1382_p0 = pnand %p1381_p5, %p1873_p8  ;;  %s1384_s14 = sshll.u32 %s1480_s27, 4  ;;  %s1385_s14 = int_to_ptr.vmem [resolvable:$false] %s1384_s14 }
  0x7b   : > { %1127 = vmatprep.subr.bf16.mxu1 %v1478_v1  ;;  %v455_v54 = vadd.f32 %v447_v45, %v393_v27  ;;  %458 = vst.msk [vmem:[#allocation2 + $0x8] sm:$0xff] %vm378_vm0, %v450_v48  ;;  %459 = vst.msk [vmem:[#allocation2 + $0x10] sm:$0xff] %vm378_vm0, %v451_v50  ;;  %s1386_s18 = scalar_lea.vmem %s1385_s14, 256  ;;  %p1387_p4 = scmp.lt.s32.totalorder %s1807_s22, %s1385_s14 }
  0x7c   : > { %460 = vst.msk [vmem:[#allocation2 + $0x18] sm:$0xff] %vm378_vm0, %v452_v51  ;;  %461 = vst.msk [vmem:[#allocation2 + $0x20] sm:$0xff] %vm378_vm0, %v453_v52  ;;  %p1383_p1 = pneg %p1382_p0  ;;  %p1388_p6 = scmp.lt.s32.totalorder %s1386_s18, %s1380_s12 }
  0x7d   : > { %462 = vst.msk [vmem:[#allocation2 + $0x28] sm:$0xff] %vm378_vm0, %v454_v53  ;;  %463 = vst.msk [vmem:[#allocation2 + $0x30] sm:$0xff] %vm378_vm0, %v455_v54 }
  0x7e   : > { %464 = vst.msk [vmem:[#allocation2 + $0x38] sm:$0xff] %vm378_vm0, %v456_v55  ;;  %1128 = vmatpush3.bf16.msra.mxu1 %v1261_v49  ;;  %p1389_p7 = por %p1388_p6, %p1387_p4 }
  0x7f   : > { %1129 = vmatprep.subr.bf16.mxu1 %v1478_v1 }
  0x80   : > { %p1390_p12 = pnand %p1389_p7, %p1383_p1 }
  0x81   : > { %v521_v58 = vld [vmem:[#allocation2] sm:$0xff] }
  0x82   : > { %1130 = vmatpush3.bf16.msra.mxu1 %v1262_v56  ;;  %v522_v59 = vld [vmem:[#allocation2 + $0x8] sm:$0xff]  ;;  %v523_v60 = vld [vmem:[#allocation2 + $0x10] sm:$0xff]  ;;  %v530_v63 = vsel %vm378_vm0, %v521_v58, 0.0 }
  0x83   : > { %1131 = vmatprep.subr.bf16.mxu1 %v1478_v1  ;;  %v524_v61 = vld [vmem:[#allocation2 + $0x18] sm:$0xff]  ;;  %v525_v62 = vld [vmem:[#allocation2 + $0x20] sm:$0xff]  ;;  %v537_v0 = vsel %vm378_vm0, %v522_v59, 0.0  ;;  %v531_v6 = vrot.slane %v530_v63, 4  ;;  %v544_v8 = vsel %vm378_vm0, %v523_v60, 0.0 }
  0x84   : > { %v526_v3 = vld [vmem:[#allocation2 + $0x28] sm:$0xff]  ;;  %v527_v4 = vld [vmem:[#allocation2 + $0x30] sm:$0xff]  ;;  %v538_v7 = vrot.slane %v537_v0, 4  ;;  %v545_v9 = vrot.slane %v544_v8, 4  ;;  %v551_v10 = vsel %vm378_vm0, %v524_v61, 0.0  ;;  %v558_v11 = vsel %vm378_vm0, %v525_v62, 0.0 }
  0x85   : > { %v528_v5 = vld [vmem:[#allocation2 + $0x38] sm:$0xff]  ;;  %v565_v12 = vsel %vm378_vm0, %v526_v3, 0.0  ;;  %v532_v13 = vadd.f32 %v531_v6, %v530_v63  ;;  %v552_v15 = vrot.slane %v551_v10, 4  ;;  %v559_v16 = vrot.slane %v558_v11, 4 }
  0x86   : > { %1132 = vmatpush3.bf16.msra.mxu1 %v1263_v57  ;;  %v539_v14 = vadd.f32 %v538_v7, %v537_v0  ;;  %v546_v17 = vadd.f32 %v545_v9, %v544_v8  ;;  %v566_v18 = vrot.slane %v565_v12, 4  ;;  %v572_v19 = vsel %vm378_vm0, %v527_v4, 0.0 }
  0x87   : > { %1133 = vmatprep.subr.bf16.mxu1 %v1478_v1  ;;  %v579_v20 = vsel %vm378_vm0, %v528_v5, 0.0  ;;  %v533_v21 = vrot.slane %v532_v13, 2  ;;  %v553_v23 = vadd.f32 %v552_v15, %v551_v10  ;;  %v560_v24 = vadd.f32 %v559_v16, %v558_v11 }
  0x88   : > { %v540_v22 = vrot.slane %v539_v14, 2  ;;  %v547_v25 = vrot.slane %v546_v17, 2  ;;  %v567_v26 = vadd.f32 %v566_v18, %v565_v12  ;;  %v573_v27 = vrot.slane %v572_v19, 4 }
  0x89   : > { %v580_v28 = vrot.slane %v579_v20, 4  ;;  %v534_v30 = vadd.f32 %v533_v21, %v532_v13  ;;  %v554_v32 = vrot.slane %v553_v23, 2  ;;  %v561_v33 = vrot.slane %v560_v24, 2 }
  0x8a   : > { %1134 = vmatpush3.bf16.msra.mxu1 %v1264_v2  ;;  %v541_v31 = vadd.f32 %v540_v22, %v539_v14  ;;  %v548_v34 = vadd.f32 %v547_v25, %v546_v17  ;;  %v568_v35 = vrot.slane %v567_v26, 2  ;;  %v574_v36 = vadd.f32 %v573_v27, %v572_v19  ;;  %v1266_v22 = vld [vmem:[#allocation8 + $0x8] sm:$0xff]   ;;  %v1269_v25 = vld [vmem:[#allocation9 + $0x30] sm:$0xff]   ;;  %v1271_v27 = vld [vmem:[#allocation9 + $0x20] sm:$0xff]  }
  0x8b   : > { %1135 = vmatprep.subr.bf16.mxu1 %v1478_v1  ;;  %v581_v37 = vadd.f32 %v580_v28, %v579_v20  ;;  %v535_v38 = vrot.slane %v534_v30, 1  ;;  %v555_v40 = vadd.f32 %v554_v32, %v553_v23  ;;  %v562_v41 = vadd.f32 %v561_v33, %v560_v24  ;;  %v1267_v23 = vld [vmem:[#allocation8] sm:$0xff]   ;;  %v1268_v24 = vld [vmem:[#allocation9 + $0x38] sm:$0xff]  }
  0x8c   : > { %v542_v39 = vrot.slane %v541_v31, 1  ;;  %v549_v42 = vrot.slane %v548_v34, 1  ;;  %v569_v43 = vadd.f32 %v568_v35, %v567_v26  ;;  %v575_v44 = vrot.slane %v574_v36, 2  ;;  %v1270_v26 = vld [vmem:[#allocation9 + $0x28] sm:$0xff]   ;;  %v1272_v28 = vld [vmem:[#allocation9 + $0x18] sm:$0xff]  }
  0x8d   : > { %v582_v45 = vrot.slane %v581_v37, 2  ;;  %v536_v46 = vadd.f32 %v535_v38, %v534_v30  ;;  %v556_v48 = vrot.slane %v555_v40, 1  ;;  %v563_v49 = vrot.slane %v562_v41, 1  ;;  %v1065_v30 = vld [vmem:[%s1855_s2] ss:$0 sm:$0xff]  ;;  %v1274_v38 = vld [vmem:[#allocation9 + $0x8] sm:$0xff]  }
  0x8e   : > { %1136 = vmatpush3.bf16.msra.mxu1 %v1265_v29  ;;  %v543_v47 = vadd.f32 %v542_v39, %v541_v31  ;;  %v550_v50 = vadd.f32 %v549_v42, %v548_v34  ;;  %v570_v51 = vrot.slane %v569_v43, 1  ;;  %v576_v52 = vadd.f32 %v575_v44, %v574_v36  ;;  %v1273_v29 = vld [vmem:[#allocation9 + $0x10] sm:$0xff]   ;;  %v1275_v39 = vld [vmem:[#allocation9] sm:$0xff]  }
  0x8f   : > { %1137 = vmatprep.subr.bf16.mxu1 %v1478_v1  ;;  %v583_v53 = vadd.f32 %v582_v45, %v581_v37  ;;  %v557_v54 = vadd.f32 %v556_v48, %v555_v40  ;;  %v564_v55 = vadd.f32 %v563_v49, %v562_v41  ;;  %v586_v56 = vpack.c.bf16 %v536_v46, %v536_v46  ;;  %v1069_v40 = vld [vmem:[%s1857_s4] ss:$0 sm:$0xff] }
  0x90   : > { %v587_v57 = vpack.c.bf16 %v543_v47, %v543_v47  ;;  %v571_v58 = vadd.f32 %v570_v51, %v569_v43  ;;  %v577_v59 = vrot.slane %v576_v52, 1  ;;  %v588_v61 = vpack.c.bf16 %v550_v50, %v550_v50 }
  0x91   : > { %v584_v60 = vrot.slane %v583_v53, 1  ;;  %v589_v62 = vpack.c.bf16 %v557_v54, %v557_v54  ;;  %v590_v63 = vpack.c.bf16 %v564_v55, %v564_v55  ;;  %v613_v0 = vunpack.c.l.b16 %v586_v56 }
  0x92   : > { %v614_v2 = vunpack.c.l.b16 %v587_v57  ;;  %v578_v3 = vadd.f32 %v577_v59, %v576_v52  ;;  %v591_v5 = vpack.c.bf16 %v571_v58, %v571_v58  ;;  %v615_v6 = vunpack.c.l.b16 %v588_v61  ;;  %1138 = vmatpush3.bf16.msra.mxu1 %v1266_v22 }
  0x93   : > { %v585_v4 = vadd.f32 %v584_v60, %v583_v53  ;;  %v616_v7 = vunpack.c.l.b16 %v589_v62  ;;  %v617_v8 = vunpack.c.l.b16 %v590_v63  ;;  %1139 = vmatprep.subr.bf16.mxu1 %v1478_v1 }
  0x94   : > { %v622_v9 = vsel %vm621_vm3, %v614_v2, %v613_v0  ;;  %v592_v10 = vpack.c.bf16 %v578_v3, %v578_v3  ;;  %v618_v12 = vunpack.c.l.b16 %v591_v5 }
  0x95   : > { %v593_v11 = vpack.c.bf16 %v585_v4, %v585_v4  ;;  %v624_v13 = vsel %vm623_vm4, %v615_v6, %v622_v9 }
  0x96   : > { %v626_v14 = vsel %vm625_vm5, %v616_v7, %v624_v13  ;;  %v619_v15 = vunpack.c.l.b16 %v592_v10  ;;  %1140 = vmatpush3.bf16.msra.mxu1 %v1267_v23 }
  0x97   : > { %v620_v16 = vunpack.c.l.b16 %v593_v11  ;;  %v628_v17 = vsel %vm627_vm6, %v617_v8, %v626_v14 }
  0x98   : > { %v630_v18 = vsel %vm629_vm7, %v618_v12, %v628_v17 }
  0x99   : > { %v632_v19 = vsel %vm631_vm8, %v619_v15, %v630_v18 }
  0x9a   : > { %v634_v20 = vsel %vm633_vm9, %v620_v16, %v632_v19 }
  0x9b   : > { %v635_v21 = vpack.c.b16 %v634_v20, %v634_v20 }
  0x9d   : > { %1122 = vmatmul.mubr.msk.bf16.vlgmr.msra.gmra.mxu0 %vm378_vm0, %v635_v21 }
  0x9e   : > { %1161 = vmatprep.mubr.msk.bf16.mxu0 %vm1479_vm1, %v1478_v1  ;;  %1146 = vmatpush3.bf16.msra.mxu0 %v1268_v24 }
  0x9f   : > { %1147 = vmatprep.subr.bf16.mxu0 %v1478_v1 }
  0xa2   : > { %1148 = vmatpush3.bf16.msra.mxu0 %v1269_v25 }
  0xa3   : > { %1149 = vmatprep.subr.bf16.mxu0 %v1478_v1 }
  0xa6   : > { %1150 = vmatpush3.bf16.msra.mxu0 %v1270_v26 }
  0xa7   : > { %1151 = vmatprep.subr.bf16.mxu0 %v1478_v1 }
  0xaa   : > { %1152 = vmatpush3.bf16.msra.mxu0 %v1271_v27 }
  0xab   : > { %1153 = vmatprep.subr.bf16.mxu0 %v1478_v1 }
  0xae   : > { %1154 = vmatpush3.bf16.msra.mxu0 %v1272_v28 }
  0xaf   : > { %1155 = vmatprep.subr.bf16.mxu0 %v1478_v1 }
  0xb2   : > { %1156 = vmatpush3.bf16.msra.mxu0 %v1273_v29 }
  0xb3   : > { %1157 = vmatprep.subr.bf16.mxu0 %v1478_v1 }
  0xb6   : > { %1158 = vmatpush3.bf16.msra.mxu0 %v1274_v38 }
  0xb7   : > { %1159 = vmatprep.subr.bf16.mxu0 %v1478_v1  ;;  %v1078_v1 = vld [vmem:[%s1859_s6] ss:$0 sm:$0xff] }
  0xba   : > { %1160 = vmatpush3.bf16.msra.mxu0 %v1275_v39 }
 0x15d   : > { %v685_v31 = vpop.f32.mrf.mxu0 }
 0x15e   : > { %v686_v32 = vadd.f32 %v1065_v30, %v685_v31 }
 0x15f   : > { %v1123_v33 = vpop.f32.mrf.mxu0 }
 0x160   : > { %v691_v34 = vmax.f32 %v686_v32, 0.0 }
 0x161   : > { %v688_v35 = vpop.f32.mrf.mxu0 }
 0x162   : > { %v692_v36 = vpack.c.bf16 %v691_v34, %v691_v34 }
 0x163   : > { %v1124_v37 = vpop.f32.mrf.mxu0 }
 0x164   : > { %1142 = vmatmul.mubr.bf16.vlgmr.msra.gmra.mxu1 %v692_v36 }
 0x224   : > { %v798_v41 = vpop.f32.mrf.mxu1 }
 0x225   : > { %v799_v42 = vadd.f32 %v1069_v40, %v798_v41 }
 0x226   : > { %v1143_v43 = vpop.f32.mrf.mxu1 }
 0x227   : > { %v804_v44 = vmax.f32 %v799_v42, 0.0 }
 0x228   : > { %v801_v45 = vpop.f32.mrf.mxu1 }
 0x229   : > { %v805_v46 = vpack.c.bf16 %v804_v44, %v804_v44 }
 0x22a   : > { %v1144_v47 = vpop.f32.mrf.mxu1 }
 0x22b   : > { %1162 = vmatmul.mubr.bf16.vlgmr.msra.gmra.mxu0 %v805_v46 }
 0x2eb   : > { %v911_v48 = vpop.f32.mrf.mxu0 }
 0x2ec   : > { %v912_v49 = vadd.f32 %v1078_v1, %v911_v48 }
 0x2ed   : > { %v1163_v50 = vpop.f32.mrf.mxu0 }
 0x2ee   : > { %917 = vst [vmem:[%s365_s9] sm:$0xff] %v912_v49 }
 0x2ef   : > { %v914_v51 = vpop.f32.mrf.mxu0 }
 0x2f0   : > { %1393 = shalt.err (!%p1390_p12)
}
 0x2f1   : > { %s1394_s23 = scalar_lea.hbm %s1805_s19, 128  ;;  %s1398_s16 = scalar_lea.hbm %s1860_s7, 256 }
 0x2f2   : > { %p1395_p11 = scmp.ne.s32.totalorder %s1805_s19, %s1394_s23  ;;  %p1399_p9 = scmp.lt.s32.totalorder %s1805_s19, %s1860_s7 }
 0x2f3   : > { %p1400_p2 = scmp.lt.s32.totalorder %s1398_s16, %s1394_s23 }
 0x2f4   : > { %p1396_p10 = pnand %p1395_p11, %p1873_p8 }
 0x2f5   : > { %p1401_p3 = por %p1400_p2, %p1399_p9 }
 0x2f6   : > { %p1397_p13 = pneg %p1396_p10 }
 0x2f8   : > { %p1402_p5 = pnand %p1401_p3, %p1397_p13 }
 0x2fa   : > { %1405 = shalt.err (!%p1402_p5)
}
 0x2fb   : > { %1178 = dma.vmem_to_hbm [thread:$0]  (%p1873_p8), %s1807_s22, 128, %s1805_s19, %s919_s11   ;;  %v1164_v52 = vpop.f32.mrf.mxu0 }
 0x2fc PF: > { %s944_s9 = sand.u32 1, %s1448_s24   ;;  %p1874_p0 = scmp.ne.s32.totalorder %s1870_s17, 0 }
 0x2fd   : > { %p1875_p1 = scmp.ge.s32.totalorder %s1468_s29, 2  ;;  %s945_s30 = scalar_lea.sflag [#allocation5], %s944_s9 }
 0x2ff   : > { %p1191_p4 = pnand %p1875_p1, %p1874_p0 }
 0x301   : > { %p1192_p6 = pneg %p1191_p4 }
 0x303   : > { %1443 = dma.done.wait (%p1192_p6), %s945_s30, 128  }
 0x304   : > { %1445 = vsyncadd (%p1192_p6), %s945_s30, 4294967168  ;;  %s25_s29 = sadd.s32 1, %s1468_s29   ;;  %s1876_s15 = sld [smem:[#allocation17_spill]] }
 0x305   : > { %p22_p7 = scmp.ge.s32.totalorder %s25_s29, 4   ;;  %s1877_s22 = sld [smem:[#allocation16_spill]] }
 0x306   : > { %s1878_s24 = smov %s1452_s25  ;;  %s1879_s25 = smov %s1456_s26 }
 0x307   : > { %s1881_s27 = smov %s1464_s28  ;;  %24 = sbr.rel (!%p22_p7) target bundleno = 8 (0x8), region = 117 }
 0x30a   : > { %s1880_s26 = smov %s1876_s15 }
 0x30b   : > { %s1882_s28 = smov %s1877_s22 }
 0x30c   :  { %950 = vsyncpa [#allocation4], 1 }
 0x30d   :  { %952 = vsyncpa [#allocation4 + $0x1], 1 }
 0x30e   :  { %953 = vsyncpa [#allocation7], 1 }
 0x30f   :  { %954 = vsyncpa [#allocation10], 1 }
 0x310   :  { %955 = vsyncpa [#allocation5], 1 }
 0x311   :  { %957 = vsyncpa [#allocation5 + $0x1], 1 }

</bundles_post_ra>
